<compile_context>
chip_gen: v5e
topology: v5e:2x2
jax: 0.10.0
libtpu: 0.0.40
codegen_flags: <defaults>
</compile_context>

<pallas_src>
import numpy as np
import jax
import jax.numpy as jnp
from jax.experimental import pallas as pl
from jax.experimental.pallas import tpu as pltpu

_TWO_PI = 2.0 * np.pi


def _round_up(x, m):
    return ((x + m - 1) // m) * m


def _pick_block_rows(R, M, block_rows=None):
    """Frame rows per grid step. Output tile is (Rb, M) f32."""
    if block_rows is None:
        # target ~2 MiB per output tile (double-buffered ~4 MiB): comfortable on v5e's
        # 16 MiB default scoped VMEM, lots of headroom on v6e / v7x.
        block_rows = max(8, (2 * 1024 * 1024) // (4 * max(1, M)))
    rb = _round_up(max(8, int(block_rows)), 8)          # keep the (8, 128) sublane constraint
    rb = min(rb, _round_up(R, 8))                       # don't over-pad short inputs
    return rb


def _hash_u32(x):
    """splitmix32-style finalizer on uint32 (plain jnp ops: works in Mosaic + interpret)."""
    x = x ^ (x >> 16)
    x = x * jnp.uint32(0x7FEB352D)
    x = x ^ (x >> 15)
    x = x * jnp.uint32(0x846CA68B)
    x = x ^ (x >> 16)
    return x


def _sine_gen_kernel(seed_ref, low_ref, amps_ref, ampn_ref, e_ref, out_ref):
    rb, m = out_ref.shape

    # ---- deterministic sine part ----------------------------------------------------------
    # phase[r, j*D+d] = pbase[r, d] + (j+1) * rad[r, d]   (one tiny-K MXU matmul)
    phase = jnp.dot(low_ref[...], e_ref[...], preferred_element_type=jnp.float32)   # (Rb, M)
    phase = phase - jnp.floor(phase)                 # keep the sin argument in [0, 2*pi)
    sines = jnp.sin(phase * _TWO_PI)

    # ---- on-chip N(0,1) noise: counter hash -> uniforms -> Box-Muller (both outputs) -------
    row0 = pl.program_id(0) * rb
    seed_u = seed_ref[0].astype(jnp.uint32) * jnp.uint32(0x9E3779B9)
    if m % 2 == 0:
        shp = (rb, m // 2)                           # one (u1, u2) pair feeds two outputs
    else:
        shp = (rb, m)                                # odd lane count: cos branch only
    r_io = jax.lax.broadcasted_iota(jnp.int32, shp, 0)
    c_io = jax.lax.broadcasted_iota(jnp.int32, shp, 1)
    pair = (row0 + r_io) * shp[1] + c_io             # unique per (global row, pair column)
    base = (2 * pair).astype(jnp.uint32) + seed_u
    b1 = _hash_u32(base)
    b2 = _hash_u32(base + jnp.uint32(1))
    u1 = ((b1 >> 8).astype(jnp.int32).astype(jnp.float32) + 1.0) * jnp.float32(1.0 / 16777216.0)
    th = (b2 >> 8).astype(jnp.int32).astype(jnp.float32) * jnp.float32(_TWO_PI / 16777216.0)
    rad = jnp.sqrt(-2.0 * jnp.log(u1))
    if m % 2 == 0:
        gauss = jnp.concatenate([rad * jnp.cos(th), rad * jnp.sin(th)], axis=1)      # (Rb, M)
    else:
        gauss = rad * jnp.cos(th)

    # amps_ref = sine_amp * uv, ampn_ref = noise amplitude (both (Rb, 1), broadcast over lanes)
    out_ref[...] = amps_ref[...] * sines + ampn_ref[...] * gauss


class SineGenPallas:
    """Pallas TPU forward pass of DiffSinger NSF-HiFiGAN SineGen (returns sine_waves)."""

    def __init__(self, samp_rate, harmonic_num=0, sine_amp=0.1, noise_std=0.003,
                 voiced_threshold=0):
        self.sine_amp = float(sine_amp)
        self.noise_std = float(noise_std)
        self.harmonic_num = int(harmonic_num)
        self.dim = self.harmonic_num + 1
        self.sampling_rate = float(samp_rate)
        self.voiced_threshold = float(voiced_threshold)

    def __call__(self, f0, upp, key, rand_ini=None, block_rows=None):
        """f0: (B, L) float32 (unvoiced frames = 0). upp: static int. Returns (B, L*upp, dim)."""
        upp = int(upp)
        B, L = f0.shape
        D = self.dim
        T = L * upp
        M = upp * D                      # lanes: (j, d) pairs within one low-rate frame
        R = B * L                        # rows : (b, l) frames

        k_phase, k_noise = jax.random.split(key)
        if rand_ini is None:             # matches torch: one (D,) random phase shared over batch
            rand_ini = jax.random.uniform(k_phase, (D,), jnp.float32)
            rand_ini = rand_ini.at[0].set(0.0)
        seed = jax.random.randint(k_noise, (1,), 0, np.iinfo(np.int32).max, dtype=jnp.int32)

        # ---- cheap low-rate prep (O(B*L*D), plain JAX) ----
        f0 = f0.astype(jnp.float32)
        harm = jnp.arange(1, D + 1, dtype=jnp.float32)
        rad = jnp.mod(f0[:, :, None] * harm / self.sampling_rate, 1.0)          # (B, L, D)
        rad = rad.at[:, 0, :].add(rand_ini)
        cum_excl = jnp.cumsum(rad, axis=1) - rad                                 # exclusive cumsum
        # per-frame phase base, already reduced mod 1 -> in-kernel phase stays O(upp).
        # TODO(synk): a compensated / f64 low-rate cumsum would remove the residual f32 mod-1
        # drift for very long clips (the torch reference accumulates in double).
        pbase = jnp.mod(cum_excl * float(upp), 1.0)                               # (B, L, D)
        uv = (f0 > self.voiced_threshold).astype(jnp.float32)                     # (B, L)

        low = jnp.concatenate([pbase, rad], axis=-1).reshape(R, 2 * D)           # (R, 2D)
        amp_s = (self.sine_amp * uv).reshape(R, 1)
        amp_n = (uv * self.noise_std + (1.0 - uv) * (self.sine_amp / 3.0)).reshape(R, 1)

        # ---- static "broadcast + ramp" matrix: phase = [pbase | rad] @ E ----
        lane = np.arange(M)
        lane_d = lane % D
        lane_j = lane // D
        E = np.zeros((2 * D, M), dtype=np.float32)
        E[lane_d, lane] = 1.0                                    # broadcast pbase over j
        E[D + lane_d, lane] = (lane_j + 1).astype(np.float32)    # (j+1) * rad
        E = jnp.asarray(E)

        # ---- block geometry ----
        Rb = _pick_block_rows(R, M, block_rows)
        C = pl.cdiv(R, Rb)
        R_pad = C * Rb
        if R_pad != R:
            pad = ((0, R_pad - R), (0, 0))
            low = jnp.pad(low, pad)
            amp_s = jnp.pad(amp_s, pad)
            amp_n = jnp.pad(amp_n, pad)

        out_w = pl.pallas_call(
            _sine_gen_kernel,
            out_shape=jax.ShapeDtypeStruct((R_pad, M), jnp.float32),
            grid_spec=pltpu.PrefetchScalarGridSpec(
                num_scalar_prefetch=1,                                   # PRNG seed -> SMEM
                grid=(C,),
                in_specs=[
                    pl.BlockSpec((Rb, 2 * D), lambda i, *_: (i, 0)),     # [pbase | rad]
                    pl.BlockSpec((Rb, 1), lambda i, *_: (i, 0)),         # sine_amp * uv
                    pl.BlockSpec((Rb, 1), lambda i, *_: (i, 0)),         # noise amplitude
                    pl.BlockSpec((2 * D, M), lambda i, *_: (0, 0)),      # broadcast/ramp matrix
                ],
                out_specs=pl.BlockSpec((Rb, M), lambda i, *_: (i, 0)),
            ),
            compiler_params=pltpu.CompilerParams(
                dimension_semantics=("parallel",)),       # no inter-block dependency -> megacore
        )(seed, low, amp_s, amp_n, E)

        # (R, upp*D) -> (B, T, D) is a pure reshape (rows = (b,l), lanes = (j,d)); no transpose.
        return out_w[:R].reshape(B, T, D)


def _sine_gen_reference(f0, upp, rand_ini, samp_rate, dim, sine_amp, voiced_threshold):
    """Pure-JAX mirror of the torch reference (deterministic sine part only)."""
    B, L = f0.shape
    T = L * upp
    harm = jnp.arange(1, dim + 1, dtype=jnp.float32)
    rad = jnp.mod(f0[:, :, None] * harm / samp_rate, 1.0)
    rad = rad.at[:, 0, :].add(rand_ini)
    tmp = jnp.cumsum(rad, axis=1) * upp
    t = np.arange(T)
    src = t * (L - 1) / (T - 1) if (T > 1 and L > 1) else np.zeros(T)
    left = np.minimum(np.floor(src).astype(np.int64), L - 1)
    frac = jnp.asarray((src - left)[None, :, None], jnp.float32)
    right = np.minimum(left + 1, L - 1)
    tmp_up = jnp.mod((1.0 - frac) * tmp[:, left, :] + frac * tmp[:, right, :], 1.0)
    rad_up = rad[:, t // upp, :]
    diff = tmp_up[:, 1:, :] - tmp_up[:, :-1, :]
    shift = jnp.concatenate(
        [jnp.zeros((B, 1, dim), jnp.float32), jnp.where(diff < 0, -1.0, 0.0)], axis=1)
    sines = jnp.sin(jnp.cumsum(rad_up + shift, axis=1) * _TWO_PI) * sine_amp
    uv_up = (f0 > voiced_threshold).astype(jnp.float32)[:, :, None][:, t // upp, :]
    return sines * uv_up, uv_up


if __name__ == "__main__":
    key = jax.random.PRNGKey(0)
    k_f0, k_uv, k_mod = jax.random.split(key, 3)

    B, L, harmonic_num, upp = 2, 48, 7, 16            # D = 8, M = upp*D = 128 lanes, T = 768
    samp_rate = 16000

    f0 = jax.random.uniform(k_f0, (B, L), jnp.float32, minval=80.0, maxval=400.0)
    voiced = (jax.random.uniform(k_uv, (B, L)) > 0.3).astype(jnp.float32)
    f0 = f0 * voiced                                   # unvoiced frames -> 0

    gen = SineGenPallas(samp_rate, harmonic_num=harmonic_num)

    rand_ini = jax.random.uniform(jax.random.split(k_mod)[0], (harmonic_num + 1,), jnp.float32)
    rand_ini = rand_ini.at[0].set(0.0)

    out = gen(f0, upp, key=k_mod, rand_ini=rand_ini, block_rows=32)   # grid of 3 row blocks
    out = jax.block_until_ready(out)

    assert out.shape == (B, L * upp, harmonic_num + 1)
    assert out.dtype == jnp.float32
    assert bool(jnp.all(jnp.isfinite(out)))

    ref_sines, uv_up = _sine_gen_reference(f0, upp, rand_ini, samp_rate,
                                           harmonic_num + 1, gen.sine_amp, gen.voiced_threshold)
    mask = jnp.broadcast_to(uv_up, out.shape)

    # Voiced samples: out = sine + noise_std * N(0,1); tolerance >> several sigma of that noise.
    voiced_err = float(jnp.max(jnp.abs((out - ref_sines) * mask)))
    assert voiced_err < 0.05, voiced_err
    # Unvoiced samples are pure (sine_amp/3)-scaled Gaussian noise.
    unvoiced_max = float(jnp.max(jnp.abs(out * (1.0 - mask))))
    assert unvoiced_max < 0.4, unvoiced_max

    # Loose distribution sanity checks on the on-chip Gaussian noise.
    n_u = float(jnp.sum(1.0 - mask))
    if n_u > 100:
        std_u = float(jnp.sqrt(jnp.sum((out * (1.0 - mask)) ** 2) / n_u))
        assert 0.015 < std_u < 0.06, std_u             # true std = sine_amp/3 ~= 0.0333
    n_v = float(jnp.sum(mask))
    if n_v > 100:
        std_v = float(jnp.sqrt(jnp.sum(((out - ref_sines) * mask) ** 2) / n_v))
        assert 0.0005 < std_v < 0.01, std_v            # true std = noise_std = 0.003

    print("KERNEL_OK")
</pallas_src>

<mosaic_0001>
module attributes {stable_mosaic.version = 11 : i64} {
  func.func @_sine_gen_kernel(%arg0: i32, %arg1: memref<1xi32, #tpu.memory_space<smem>>, %arg2: memref<32x16xf32, #tpu.memory_space<vmem>>, %arg3: memref<32x1xf32, #tpu.memory_space<vmem>>, %arg4: memref<32x1xf32, #tpu.memory_space<vmem>>, %arg5: memref<16x128xf32, #tpu.memory_space<vmem>>, %arg6: memref<32x128xf32, #tpu.memory_space<vmem>>) attributes {dimension_semantics = [#tpu.dimension_semantics<parallel>], iteration_bounds = array<i64: 3>, scalar_prefetch = 1 : i64, scratch_operands = 0 : i64, tpu.core_type = #tpu.core_type<tc>, window_params = [{transform_indices = @transform_0, window_bounds = array<i64: 32, 16>}, {transform_indices = @transform_1, window_bounds = array<i64: 32, 1>}, {transform_indices = @transform_2, window_bounds = array<i64: 32, 1>}, {pipeline_mode = #tpu.pipeline_mode<synchronous>, transform_indices = @transform_3, window_bounds = array<i64: 16, 128>}, {transform_indices = @transform_4, window_bounds = array<i64: 32, 128>}]} {
    %c0 = arith.constant 0 : index
    %c0_0 = arith.constant 0 : index
    %0 = vector.load %arg2[%c0, %c0_0] : memref<32x16xf32, #tpu.memory_space<vmem>>, vector<32x16xf32>
    %c0_1 = arith.constant 0 : index
    %c0_2 = arith.constant 0 : index
    %1 = vector.load %arg5[%c0_1, %c0_2] : memref<16x128xf32, #tpu.memory_space<vmem>>, vector<16x128xf32>
    %cst = arith.constant dense<0.000000e+00> : vector<32x128xf32>
    %2 = tpu.matmul %0, %1, %cst {dimension_numbers = #tpu.dot_dimension_numbers<[1], [0], [0], [1], [0, 0, 1, 1], [], []>} : vector<32x16xf32>, vector<16x128xf32>, vector<32x128xf32> -> vector<32x128xf32>
    %3 = math.floor %2 : vector<32x128xf32>
    %4 = arith.subf %2, %3 : vector<32x128xf32>
    %cst_3 = arith.constant 6.28318548 : f32
    %5 = vector.broadcast %cst_3 : f32 to vector<32x128xf32>
    %6 = arith.mulf %4, %5 : vector<32x128xf32>
    %7 = math.sin %6 : vector<32x128xf32>
    %c32_i32 = arith.constant 32 : i32
    %8 = arith.muli %arg0, %c32_i32 : i32
    %c0_4 = arith.constant 0 : index
    %9 = memref.load %arg1[%c0_4] : memref<1xi32, #tpu.memory_space<smem>>
    %c-1640531527_i32 = arith.constant -1640531527 : i32
    %10 = arith.muli %9, %c-1640531527_i32 : i32
    %11 = tpu.iota {dimensions = array<i32: 0>} : vector<32x64xi32>
    %12 = tpu.iota {dimensions = array<i32: 1>} : vector<32x64xi32>
    %13 = vector.broadcast %8 : i32 to vector<32x64xi32>
    %14 = arith.addi %13, %11 : vector<32x64xi32>
    %c64_i32 = arith.constant 64 : i32
    %15 = vector.broadcast %c64_i32 : i32 to vector<32x64xi32>
    %16 = arith.muli %14, %15 : vector<32x64xi32>
    %17 = arith.addi %16, %12 : vector<32x64xi32>
    %c2_i32 = arith.constant 2 : i32
    %18 = vector.broadcast %c2_i32 : i32 to vector<32x64xi32>
    %19 = arith.muli %18, %17 : vector<32x64xi32>
    %20 = vector.broadcast %10 : i32 to vector<32x64xi32>
    %21 = arith.addi %19, %20 : vector<32x64xi32>
    %c16_i32 = arith.constant 16 : i32
    %22 = vector.broadcast %c16_i32 : i32 to vector<32x64xi32>
    %23 = arith.shrui %21, %22 : vector<32x64xi32>
    %24 = arith.xori %21, %23 : vector<32x64xi32>
    %c2146121005_i32 = arith.constant 2146121005 : i32
    %25 = vector.broadcast %c2146121005_i32 : i32 to vector<32x64xi32>
    %26 = arith.muli %24, %25 : vector<32x64xi32>
    %c15_i32 = arith.constant 15 : i32
    %27 = vector.broadcast %c15_i32 : i32 to vector<32x64xi32>
    %28 = arith.shrui %26, %27 : vector<32x64xi32>
    %29 = arith.xori %26, %28 : vector<32x64xi32>
    %c-2073254261_i32 = arith.constant -2073254261 : i32
    %30 = vector.broadcast %c-2073254261_i32 : i32 to vector<32x64xi32>
    %31 = arith.muli %29, %30 : vector<32x64xi32>
    %c16_i32_5 = arith.constant 16 : i32
    %32 = vector.broadcast %c16_i32_5 : i32 to vector<32x64xi32>
    %33 = arith.shrui %31, %32 : vector<32x64xi32>
    %34 = arith.xori %31, %33 : vector<32x64xi32>
    %c1_i32 = arith.constant 1 : i32
    %35 = vector.broadcast %c1_i32 : i32 to vector<32x64xi32>
    %36 = arith.addi %21, %35 : vector<32x64xi32>
    %c16_i32_6 = arith.constant 16 : i32
    %37 = vector.broadcast %c16_i32_6 : i32 to vector<32x64xi32>
    %38 = arith.shrui %36, %37 : vector<32x64xi32>
    %39 = arith.xori %36, %38 : vector<32x64xi32>
    %c2146121005_i32_7 = arith.constant 2146121005 : i32
    %40 = vector.broadcast %c2146121005_i32_7 : i32 to vector<32x64xi32>
    %41 = arith.muli %39, %40 : vector<32x64xi32>
    %c15_i32_8 = arith.constant 15 : i32
    %42 = vector.broadcast %c15_i32_8 : i32 to vector<32x64xi32>
    %43 = arith.shrui %41, %42 : vector<32x64xi32>
    %44 = arith.xori %41, %43 : vector<32x64xi32>
    %c-2073254261_i32_9 = arith.constant -2073254261 : i32
    %45 = vector.broadcast %c-2073254261_i32_9 : i32 to vector<32x64xi32>
    %46 = arith.muli %44, %45 : vector<32x64xi32>
    %c16_i32_10 = arith.constant 16 : i32
    %47 = vector.broadcast %c16_i32_10 : i32 to vector<32x64xi32>
    %48 = arith.shrui %46, %47 : vector<32x64xi32>
    %49 = arith.xori %46, %48 : vector<32x64xi32>
    %c8_i32 = arith.constant 8 : i32
    %50 = vector.broadcast %c8_i32 : i32 to vector<32x64xi32>
    %51 = arith.shrui %34, %50 : vector<32x64xi32>
    %52 = arith.sitofp %51 : vector<32x64xi32> to vector<32x64xf32>
    %cst_11 = arith.constant 1.000000e+00 : f32
    %53 = vector.broadcast %cst_11 : f32 to vector<32x64xf32>
    %54 = arith.addf %52, %53 : vector<32x64xf32>
    %cst_12 = arith.constant 5.96046448E-8 : f32
    %55 = vector.broadcast %cst_12 : f32 to vector<32x64xf32>
    %56 = arith.mulf %54, %55 : vector<32x64xf32>
    %c8_i32_13 = arith.constant 8 : i32
    %57 = vector.broadcast %c8_i32_13 : i32 to vector<32x64xi32>
    %58 = arith.shrui %49, %57 : vector<32x64xi32>
    %59 = arith.sitofp %58 : vector<32x64xi32> to vector<32x64xf32>
    %cst_14 = arith.constant 3.74507039E-7 : f32
    %60 = vector.broadcast %cst_14 : f32 to vector<32x64xf32>
    %61 = arith.mulf %59, %60 : vector<32x64xf32>
    %62 = math.log %56 : vector<32x64xf32>
    %cst_15 = arith.constant -2.000000e+00 : f32
    %63 = vector.broadcast %cst_15 : f32 to vector<32x64xf32>
    %64 = arith.mulf %63, %62 : vector<32x64xf32>
    %65 = math.sqrt %64 : vector<32x64xf32>
    %66 = math.cos %61 : vector<32x64xf32>
    %67 = arith.mulf %65, %66 : vector<32x64xf32>
    %68 = math.sin %61 : vector<32x64xf32>
    %69 = arith.mulf %65, %68 : vector<32x64xf32>
    %70 = tpu.concatenate %67, %69 in 1 : vector<32x64xf32>, vector<32x64xf32> -> vector<32x128xf32>
    %c0_16 = arith.constant 0 : index
    %c0_17 = arith.constant 0 : index
    %71 = vector.load %arg3[%c0_16, %c0_17] : memref<32x1xf32, #tpu.memory_space<vmem>>, vector<32x1xf32>
    %72 = vector.broadcast %71 : vector<32x1xf32> to vector<32x128xf32>
    %73 = arith.mulf %72, %7 : vector<32x128xf32>
    %c0_18 = arith.constant 0 : index
    %c0_19 = arith.constant 0 : index
    %74 = vector.load %arg4[%c0_18, %c0_19] : memref<32x1xf32, #tpu.memory_space<vmem>>, vector<32x1xf32>
    %75 = vector.broadcast %74 : vector<32x1xf32> to vector<32x128xf32>
    %76 = arith.mulf %75, %70 : vector<32x128xf32>
    %77 = arith.addf %73, %76 : vector<32x128xf32>
    %c0_20 = arith.constant 0 : index
    %c0_21 = arith.constant 0 : index
    %78 = vector.load %arg6[%c0_20, %c0_21] : memref<32x128xf32, #tpu.memory_space<vmem>>, vector<32x128xf32>
    tpu.vector_store %arg6[%c0_20, %c0_21], %77 {strides = array<i32>} : memref<32x128xf32, #tpu.memory_space<vmem>>, vector<32x128xf32>,
    return
  }
  func.func @transform_0(%arg0: i32, %arg1: memref<1xi32, #tpu.memory_space<smem>>) -> (i32, i32) {
    %c0_i32 = arith.constant 0 : i32
    %c0_i32_0 = arith.constant 0 : i32
    return %arg0, %c0_i32 : i32, i32
  }
  func.func @transform_1(%arg0: i32, %arg1: memref<1xi32, #tpu.memory_space<smem>>) -> (i32, i32) {
    %c0_i32 = arith.constant 0 : i32
    %c0_i32_0 = arith.constant 0 : i32
    return %arg0, %c0_i32 : i32, i32
  }
  func.func @transform_2(%arg0: i32, %arg1: memref<1xi32, #tpu.memory_space<smem>>) -> (i32, i32) {
    %c0_i32 = arith.constant 0 : i32
    %c0_i32_0 = arith.constant 0 : i32
    return %arg0, %c0_i32 : i32, i32
  }
  func.func @transform_3(%arg0: i32, %arg1: memref<1xi32, #tpu.memory_space<smem>>) -> (i32, i32) {
    %c0_i32 = arith.constant 0 : i32
    %c0_i32_0 = arith.constant 0 : i32
    %c0_i32_1 = arith.constant 0 : i32
    return %c0_i32, %c0_i32_0 : i32, i32
  }
  func.func @transform_4(%arg0: i32, %arg1: memref<1xi32, #tpu.memory_space<smem>>) -> (i32, i32) {
    %c0_i32 = arith.constant 0 : i32
    %c0_i32_0 = arith.constant 0 : i32
    return %arg0, %c0_i32 : i32, i32
  }
}

</mosaic_0001>

<bundles_post_ra>
// kernel: tpu_custom_call.1
= control target key start
LH: loop header
LB: loop body
LE: loop exit
PB: predicated region body
PF: predicated region fallthrough
CT: control target
= control target key end

     0   :  { %s4047_s0 = inlined_call_operand.<no memory space> [shape: s32[1], index: 0, kind: input, shape index: {}]   ;;  %s4048_s1 = inlined_call_operand.vmem [shape: f32[96,16], index: 1, kind: input, shape index: {}]   ;;  %s4049_s2 = inlined_call_operand.vmem [shape: f32[96,1], index: 2, kind: input, shape index: {}]   ;;  %s4050_s3 = inlined_call_operand.vmem [shape: f32[96,1], index: 3, kind: input, shape index: {}]   ;;  %s4051_s4 = inlined_call_operand.vmem [shape: f32[16,128], index: 4, kind: input, shape index: {}]   ;;  %s4052_s5 = inlined_call_operand.hbm [shape: f32[96,128], index: 5, kind: output, shape index: {}]  }
   0x1   :  { %10 = sst [smem:[#allocation3]] %s4047_s0 }
   0x2   :  { %11 = vsyncpa [#allocation5], 0 }
   0x3   :  { %13 = vsyncpa [#allocation5 + $0x1], 0  ;;  %s2783_s20 = smov 0   ;;  %s2785_s21 = smov 0  }
   0x4   :  { %s2787_s22 = smov 0   ;;  %s2789_s23 = smov 0  }
   0x5 LB: > { %s2804_s0 = sadd.s32 4294967295, %s2738_s23   ;;  %s2544_s24 = sadd.s32 4294967294, %s2738_s23   ;;  %s2738_s23 = sphi %s2789_s23, %s4094_s23   ;;  %s2734_s22 = sphi %s2787_s22, %s4093_s22   ;;  %s2730_s21 = sphi %s2785_s21, %s4092_s21   ;;  %s2726_s20 = sphi %s2783_s20, %s4091_s20  }
   0x6   : > { %s2808_s25 = sadd.s32 1, %s2738_s23   ;;  %s125_s26 = sadd.s32 1, %s2734_s22 }
   0x7   : > { %s122_s27 = ssub.s32 %s2738_s23, %s2808_s25  ;;  %p135_p0 = scmp.ne.s32.totalorder %s2734_s22, %s2730_s21 }
   0x8   : > { %p123_p1 = scmp.eq.s32.totalorder %s122_s27, 0  ;;  %p136_p2 = scmp.eq.s32.totalorder %s2804_s0, 2 }
   0x9   : > { %p141_p3 = scmp.ne.s32.totalorder %s2730_s21, %s2726_s20  ;;  %p142_p4 = scmp.eq.s32.totalorder %s2544_s24, 2 }
   0xa   : > { %s2819_s28 = scalar_select %p123_p1, %s2734_s22, %s125_s26  }
   0xb   : > { %p2821_p5 = por %p136_p2, %p135_p0  ;;  %p2825_p6 = por %p142_p4, %p141_p3 }
   0xc   : > { %p2547_p7 = scmp.ge.s32.totalorder %s2738_s23, 1  ;;  %p190_p8 = scmp.lt.s32.totalorder %s2738_s23, 4 }
   0xe   : > { %p191_p9 = pnand %p2547_p7, %p190_p8 }
   0xf   : > { %s2549_s10 = sshll.u32 (!%p191_p9), %s2804_s0, 2  ;;  %s2571_s11 = sshll.u32 (!%p191_p9), %s2804_s0, 5 }
  0x10   : > { %194 = sbr.rel (%p191_p9) target bundleno = 457 (0x1c9), region = 36  ;;  %p227_p10 = scmp.lt.s32.totalorder (!%p191_p9), %s2549_s10, 11 }
  0x11   : > { %s2839_s12 = sld [smem:[#allocation3]] (!%p191_p9)  ;;  %s2747_s26 = smov (!%p191_p9), 64  }
  0x12   : > { %s223_s8 = sand.u32 (!%p191_p9), 1, %s2730_s21   ;;  %s2454_s14 = scalar_lea.hbm (!%p191_p9), %s4052_s5, %s2571_s11 }
  0x13   : > { %s2548_s9 = sshll.u32 (!%p191_p9), %s223_s8, 5  ;;  %s2443_s0 = scalar_lea.sflag (!%p191_p9), [#allocation5], %s223_s8 }
  0x15   : > { %v250_v0 = vld [vmem:[%s4051_s4 + $0x8] sm:$0xff]  ;;  %v249_v1 = vld [vmem:[%s4051_s4] sm:$0xff]  ;;  %v928_v2 = vlaneseq  ;;  %v2843_v3 = vstv %s2571_s11  ;;  %s4096_s10 = smov (!%p227_p10, %s2549_s10), 11  ;;  %vm251_vm0 = vcmask 130048   ;;  %v2740_v8 = vmov 0  }
  0x16   : > { %278 = vmatpush.msra.mxu0 %v250_v0  ;;  %2602 = vmatpush.msra.mxu1 %v250_v0  ;;  %s2852_s13 = sshll.u32 %s4096_s10, 3  ;;  %s3960_s10 = scalar_lea.vmem [#allocation4], %s2548_s9 }
  0x17   : > { %2603 = vmatpush.msra.mxu2 %v250_v0  ;;  %2604 = vmatpush.msra.mxu3 %v250_v0  ;;  %v2845_v4 = vshrl.u32 %v928_v2, 7  ;;  %v2847_v5 = vand.u32 127, %v928_v2  ;;  %s230_s16 = scalar_lea.vmem %s4048_s1, %s2852_s13  ;;  %s2864_s19 = scalar_lea.vmem %s4049_s2, %s2852_s13 }
  0x18   : > { %279 = vmatpush.msra.mxu0 %v249_v1  ;;  %2605 = vmatpush.msra.mxu1 %v249_v1  ;;  %v245_v11 = vld [vmem:[%s230_s16] sm:$0xff]  ;;  %v246_v12 = vld [vmem:[%s230_s16 + $0x8] sm:$0xff]  ;;  %v247_v13 = vld [vmem:[%s230_s16 + $0x10] sm:$0xff]  ;;  %s927_s24 = smul.u32 2654435769, %s2839_s12  ;;  %s3381_s7 = scalar_lea.vmem %s4050_s3, %s2852_s13 }
  0x19   : > { %2606 = vmatpush.msra.mxu2 %v249_v1  ;;  %2607 = vmatpush.msra.mxu3 %v249_v1  ;;  %v936_v6 = vadd.s32 %v2843_v3, %v2845_v4  ;;  %v931_v7 = vadd.s32 16, %v2845_v4  ;;  %v248_v14 = vld [vmem:[%s230_s16 + $0x18] sm:$0xff]  ;;  %v2380_v16 = vld [vmem:[%s2864_s19 + $0x10] sm:$0xff]  ;;  %v2378_v19 = vld [vmem:[%s2864_s19] sm:$0xff]  ;;  %v930_v45 = vadd.s32 8, %v2845_v4  ;;  %s2455_s15 = sshll.u32 %s3960_s10, 4  ;;  %s2456_s15 = int_to_ptr.vmem [resolvable:$true] %s2455_s15 }
  0x1a   : > { %2659 = vset.pattern.permute.xlu1 %v2740_v8  ;;  %2658 = vset.pattern.permute.xlu0 %v2740_v8  ;;  %v2381_v15 = vld [vmem:[%s2864_s19 + $0x18] sm:$0xff]  ;;  %v2877_v20 = vstv %s927_s24  ;;  %s2457_s16 = sshll.u32 %s2454_s14, 4  ;;  %s2696_s24 = scalar_lea.hbm %s4052_s5, 96  ;;  %s2458_s16 = int_to_ptr.hbm [resolvable:$true] %s2457_s16 }
  0x1b   : > { %2657 = vset.pattern.permute.xlu2 %v2740_v8  ;;  %v940_v9 = vmul.u32 64, %v936_v6  ;;  %v938_v10 = vadd.s32 %v2843_v3, %v931_v7  ;;  %2555 = vmatmul.msk.f32.vlgmr.msra.gmra.mxu0 %vm251_vm0, %v245_v11  ;;  %v937_v50 = vadd.s32 %v2843_v3, %v930_v45  ;;  %s2690_s11 = sshra.s32 %s2458_s16, 4  ;;  %s2691_s11 = int_to_ptr.hbm [resolvable:$true] %s2690_s11 }
  0x1c   : > { %2556 = vmatmul.msk.f32.vlgmr.msra.gmra.mxu1 %vm251_vm0, %v246_v12  ;;  %2557 = vmatmul.msk.f32.vlgmr.msra.gmra.mxu2 %vm251_vm0, %v247_v13  ;;  %v4061_v12 = vmov 683565275   ;;  %s2692_s17 = scalar_lea.hbm %s2691_s11, 32  ;;  %p2697_p0 = scmp.lt.s32.totalorder %s2691_s11, %s4052_s5 }
  0x1d   : > { %v944_v17 = vadd.s32 %v940_v9, %v2847_v5  ;;  %v942_v18 = vmul.u32 64, %v938_v10  ;;  %2558 = vmatmul.msk.f32.vlgmr.msra.gmra.mxu3 %vm251_vm0, %v248_v14  ;;  %2399 = vperm.xlu1 %2659, %v2381_v15   ;;  %v941_v57 = vmul.u32 64, %v937_v50  ;;  %v2742_v14 = vmov 2475754826   ;;  %p2693_p11 = scmp.ne.s32.totalorder %s2691_s11, %s2692_s17  ;;  %p2698_p1 = scmp.lt.s32.totalorder %s2696_s24, %s2692_s17 }
  0x1e   : > { %2394 = vperm.xlu0 %2658, %v2380_v16   ;;  %2384 = vperm.xlu2 %2657, %v2378_v19   ;;  %v4063_v16 = vmov 2131351028   ;;  %v4060_v19 = vmov 2102212464  }
  0x1f   : > { %v948_v21 = vmul.u32 2, %v944_v17  ;;  %v946_v22 = vadd.s32 %v942_v18, %v2847_v5  ;;  %v945_v62 = vadd.s32 %v941_v57, %v2847_v5  ;;  %p2694_p12 = pnand %p2693_p11, %p2821_p5  ;;  %p2699_p2 = por %p2698_p1, %p2697_p0 }
  0x21   : > { %v953_v23 = vadd.s32 %v2877_v20, %v948_v21  ;;  %v950_v24 = vmul.u32 2, %v946_v22  ;;  %v949_v10 = vmul.u32 2, %v945_v62  ;;  %v2745_v22 = vmov 920167782   ;;  %p2695_p13 = pneg %p2694_p12 }
  0x23   : > { %v989_v25 = vadd.s32 1, %v953_v23  ;;  %v2882_v26 = vadd.s32 %v2877_v20, %v950_v24  ;;  %v957_v63 = vshrl.u32 %v953_v23, 16  ;;  %p2700_p3 = pnand %p2699_p2, %p2695_p13 }
  0x25   : > { %v993_v27 = vshrl.u32 %v989_v25, 16  ;;  %v991_v28 = vadd.s32 1, %v2882_v26  ;;  %v961_v7 = vxor.u32 %v957_v63, %v953_v23  ;;  %v959_v63 = vshrl.u32 %v2882_v26, 16 }
  0x27   : > { %v997_v29 = vxor.u32 %v993_v27, %v989_v25  ;;  %v995_v30 = vshrl.u32 %v991_v28, 16  ;;  %v965_v18 = vmul.u32 2146121005, %v961_v7 }
  0x29   : > { %v1001_v31 = vmul.u32 2146121005, %v997_v29  ;;  %v999_v32 = vxor.u32 %v995_v30, %v991_v28  ;;  %v969_v30 = vshrl.u32 %v965_v18, 15 }
  0x2b   : > { %v1005_v33 = vshrl.u32 %v1001_v31, 15  ;;  %v1003_v34 = vmul.u32 2146121005, %v999_v32  ;;  %v2746_v32 = vmov 1326507024  }
  0x2d   : > { %v1009_v35 = vxor.u32 %v1005_v33, %v1001_v31  ;;  %v1007_v36 = vshrl.u32 %v1003_v34, 15 }
  0x2f   : > { %v1013_v37 = vmul.u32 2221713035, %v1009_v35  ;;  %v1011_v38 = vxor.u32 %v1007_v36, %v1003_v34 }
  0x31   : > { %v1017_v39 = vshrl.u32 %v1013_v37, 16  ;;  %v1015_v40 = vmul.u32 2221713035, %v1011_v38 }
  0x33   : > { %v1021_v41 = vxor.u32 %v1017_v39, %v1013_v37  ;;  %v1019_v42 = vshrl.u32 %v1015_v40, 16  ;;  %v973_v37 = vxor.u32 %v969_v30, %v965_v18 }
  0x35   : > { %v1041_v43 = vshrl.u32 %v1021_v41, 8  ;;  %v1023_v44 = vxor.u32 %v1019_v42, %v1015_v40 }
  0x37   : > { %v1045_v46 = vcvt.s32.f32 %v1041_v43  ;;  %v1043_v47 = vshrl.u32 %v1023_v44, 8  ;;  %v977_v43 = vmul.u32 2221713035, %v973_v37 }
  0x39   : > { %v2886_v48 = vmul.f32 3.7450704e-07, %v1045_v46  ;;  %v1047_v49 = vcvt.s32.f32 %v1043_v47  ;;  %v2926_v46 = vadd.s32 %v2877_v20, %v949_v10 }
  0x3b   : > { %v1113_v51 = vand.u32 2147483647, %v2886_v48  ;;  %v1116_v52 = vand.u32 2139095040, %v2886_v48  ;;  %v2891_v53 = vmul.f32 3.7450704e-07, %v1047_v49 }
  0x3d   : > { %v1117_v54 = vshrl.u32 %v1116_v52, 23  ;;  %v1120_v55 = vand.u32 8388607, %v1113_v51  ;;  %v1424_v56 = vand.u32 2139095040, %v2891_v53  ;;  %v981_v52 = vshrl.u32 %v977_v43, 16 }
  0x3f   : > { %v2572_v58 = vadd.s32 4294967169, %v1117_v54  ;;  %v1121_v59 = vor.u32 8388608, %v1120_v55  ;;  %v1425_v61 = vshrl.u32 %v1424_v56, 23  ;;  %v1421_v56 = vand.u32 2147483647, %v2891_v53 }
  0x41   : > { %v1123_v60 = vadd.s32 1, %v2572_v58  ;;  %v2897_v1 = vshll.u32 %v1121_v59, 8  ;;  %v2578_v6 = vadd.s32 4294967169, %v1425_v61  ;;  %v985_v61 = vxor.u32 %v981_v52, %v977_v43 }
  0x43   : > { %vm1124_vm1 = vcmp.gt.s32.totalorder %v1123_v60, 0  ;;  %v1162_v24 = vand.u32 65535, %v2897_v1  ;;  %v1431_v29 = vadd.s32 1, %v2578_v6  ;;  %v1163_v42 = vshrl.u32 %v2897_v1, 16 }
  0x44   : > { %v1125_v0 = vsel %vm1124_vm1, %v1123_v60, 0 }
  0x45   : > { %v1127_v2 = vand.u32 31, %v1125_v0  ;;  %v2899_v9 = vshrl.u32 %v1125_v0, 5  ;;  %vm1432_vm6 = vcmp.gt.s32.totalorder %v1431_v29, 0 }
  0x46   : > { %v1433_v0 = vsel %vm1432_vm6, %v1431_v29, 0  ;;  %v963_v29 = vxor.u32 %v959_v63, %v2882_v26  ;;  %vm1115_vm6 = vcmp.lt.s32.totalorder %v2886_v48, 0 }
  0x47   : > { %v1128_v11 = vsub.s32 32, %v1127_v2  ;;  %v1130_v13 = vshll.u32 %v4061_v12, %v1127_v2  ;;  %v1133_v15 = vshll.u32 %v2742_v14, %v1127_v2  ;;  %v1136_v17 = vshll.u32 %v4063_v16, %v1127_v2 }
  0x48   : > { %v1139_v21 = vshll.u32 %v4060_v19, %v1127_v2  ;;  %v1142_v23 = vshll.u32 %v2745_v22, %v1127_v2  ;;  %vm1145_vm2 = vcmp.lt.s32.totalorder %v2899_v9, 1  ;;  %vm1147_vm3 = vcmp.lt.s32.totalorder %v2899_v9, 3 }
  0x49   : > { %v1131_v25 = vshrl.u32 %v2742_v14, %v1128_v11  ;;  %v1134_v27 = vshrl.u32 %v4063_v16, %v1128_v11  ;;  %v1137_v28 = vshrl.u32 %v4060_v19, %v1128_v11  ;;  %v1140_v31 = vshrl.u32 %v2745_v22, %v1128_v11 }
  0x4a   : > { %v1143_v33 = vshrl.u32 %v2746_v32, %v1128_v11  ;;  %vm1148_vm4 = vcmp.lt.s32.totalorder %v2899_v9, 4  ;;  %vm1146_vm5 = vcmp.lt.s32.totalorder %v2899_v9, 2  ;;  %v1129_v47 = vshrl.u32 %v4061_v12, %v1128_v11 }
  0x4b   : > { %v1132_v34 = vor.u32 %v1131_v25, %v1130_v13  ;;  %v1135_v35 = vor.u32 %v1134_v27, %v1133_v15  ;;  %v1138_v36 = vor.u32 %v1137_v28, %v1136_v17  ;;  %v1141_v38 = vor.u32 %v1140_v31, %v1139_v21 }
  0x4c   : > { %v1144_v39 = vor.u32 %v1143_v33, %v1142_v23  ;;  %v1025_v11 = vshrl.u32 %v985_v61, 8  ;;  %v1435_v30 = vand.u32 31, %v1433_v0 }
  0x4d   : > { %v1153_v40 = vsel %vm1145_vm2, %v1132_v34, %v1135_v35  ;;  %v1157_v41 = vsel %vm1145_vm2, %v1135_v35, %v1138_v36  ;;  %v1154_v44 = vsel %vm1148_vm4, %v1141_v38, 920167782  ;;  %v1150_v62 = vsel %vm1148_vm4, %v1138_v36, 2102212464 }
  0x4e   : > { %v1158_v45 = vsel %vm1148_vm4, %v1144_v39, 1326507024  ;;  %v1155_v49 = vsel %vm1147_vm3, %v1138_v36, %v1154_v44  ;;  %v1149_v2 = vsel %vm1145_vm2, %v1129_v47, %v1132_v34  ;;  %v1151_v18 = vsel %vm1147_vm3, %v1135_v35, %v1150_v62 }
  0x4f   : > { %v1159_v50 = vsel %vm1147_vm3, %v1141_v38, %v1158_v45  ;;  %v1156_v54 = vsel %vm1146_vm5, %v1153_v40, %v1155_v49  ;;  %v1029_v31 = vcvt.s32.f32 %v1025_v11  ;;  %v967_v45 = vmul.u32 2146121005, %v963_v29 }
  0x50   : > { %v1160_v55 = vsel %vm1146_vm5, %v1157_v41, %v1159_v50  ;;  %v1186_v59 = vand.u32 65535, %v1156_v54  ;;  %v1187_v60 = vshrl.u32 %v1156_v54, 16  ;;  %v1152_v47 = vsel %vm1146_vm5, %v1149_v2, %v1151_v18 }
  0x51   : > { %v1164_v57 = vand.u32 65535, %v1160_v55  ;;  %v1165_v58 = vshrl.u32 %v1160_v55, 16  ;;  %v1033_v26 = vadd.f32 1.0, %v1029_v31  ;;  %v2952_v52 = vsub.s32 32, %v1435_v30 }
  0x52   : > { %v1188_v13 = vmul.u32 %v1186_v59, %v1162_v24  ;;  %v1189_v15 = vmul.u32 %v1187_v60, %v1162_v24  ;;  %v1190_v17 = vmul.u32 %v1186_v59, %v1163_v42  ;;  %v1191_v27 = vmul.u32 %v1187_v60, %v1163_v42 }
  0x53   : > { %v1166_v6 = vmul.u32 %v1164_v57, %v1162_v24  ;;  %v1167_v7 = vmul.u32 %v1165_v58, %v1162_v24  ;;  %v1168_v10 = vmul.u32 %v1164_v57, %v1163_v42  ;;  %v1169_v21 = vmul.u32 %v1165_v58, %v1163_v42 }
  0x54   : > { %v1192_v28 = vshll.u32 %v1189_v15, 16  ;;  %v1194_v34 = vshll.u32 %v1190_v17, 16  ;;  %v1193_v41 = vshrl.u32 %v1189_v15, 16  ;;  %v1195_v49 = vshrl.u32 %v1190_v17, 16 }
  0x55   : > { %v1170_v23 = vshll.u32 %v1167_v7, 16  ;;  %v1172_v25 = vshll.u32 %v1168_v10, 16  ;;  %v1171_v36 = vshrl.u32 %v1167_v7, 16  ;;  %v1173_v38 = vshrl.u32 %v1168_v10, 16 }
  0x56   : > { %vm1196_vm8 = vc.u32 %v1188_v13, %v1192_v28  ;;  %v1198_v24 = vadd.s32 %v1192_v28, %v1188_v13  ;;  %v1428_v58 = vand.u32 8388607, %v1421_v56  ;;  %v990_v59 = vadd.s32 1, %v2926_v46 }
  0x57   : > { %vm1174_vm7 = vc.u32 %v1166_v6, %v1170_v23  ;;  %v1176_v33 = vadd.s32 %v1170_v23, %v1166_v6  ;;  %v1197_v35 = vsel %vm1196_vm8, 1, %v2740_v8  ;;  %v1037_v60 = vmul.f32 5.9604645e-08, %v1033_v26 }
  0x58   : > { %v1175_v37 = vsel %vm1174_vm7, 1, %v2740_v8  ;;  %v1199_v42 = vadd.s32 %v1197_v35, %v1191_v27  ;;  %vm1200_vm10 = vc.u32 %v1198_v24, %v1194_v34  ;;  %v2954_v55 = vadd.s32 %v1198_v24, %v1194_v34 }
  0x59   : > { %v1177_v39 = vadd.s32 %v1175_v37, %v1169_v21  ;;  %vm1178_vm9 = vc.u32 %v1176_v33, %v1172_v25  ;;  %v1201_v44 = vsel %vm1200_vm10, 1, %v2740_v8  ;;  %v1206_v62 = vmul.u32 %v2897_v1, %v1152_v47 }
  0x5a   : > { %v1179_v40 = vsel %vm1178_vm9, 1, %v2740_v8  ;;  %v1203_v50 = vadd.s32 %v1201_v44, %v1199_v42  ;;  %v971_v9 = vshrl.u32 %v967_v45, 15  ;;  %v1441_v2 = vshll.u32 %v2742_v14, %v1435_v30 }
  0x5b   : > { %v1181_v43 = vadd.s32 %v1179_v40, %v1177_v39  ;;  %v1447_v6 = vshll.u32 %v4060_v19, %v1435_v30  ;;  %v1448_v7 = vshrl.u32 %v2745_v22, %v2952_v52  ;;  %v1442_v10 = vshrl.u32 %v4063_v16, %v2952_v52 }
  0x5c   : > { %v1204_v57 = vadd.s32 %v1203_v50, %v1193_v41  ;;  %v1444_v11 = vshll.u32 %v4063_v16, %v1435_v30  ;;  %v1445_v1 = vshrl.u32 %v4060_v19, %v2952_v52  ;;  %v2973_v15 = vshrl.u32 %v1433_v0, 5 }
  0x5d   : > { %v1182_v54 = vadd.s32 %v1181_v43, %v1171_v36  ;;  %v1450_v17 = vshll.u32 %v2745_v22, %v1435_v30  ;;  %v1451_v18 = vshrl.u32 %v2746_v32, %v2952_v52  ;;  %2660 = vlog2.f32 %v1037_v60 }
  0x5e   : > { %v1205_v63 = vadd.s32 %v1204_v57, %v1195_v49  ;;  %v1438_v21 = vshll.u32 %v4061_v12, %v1435_v30  ;;  %v1439_v23 = vshrl.u32 %v2742_v14, %v2952_v52  ;;  %v1449_v27 = vor.u32 %v1448_v7, %v1447_v6 }
  0x5f   : > { %v2959_v61 = vadd.s32 %v1182_v54, %v1173_v38  ;;  %v994_v28 = vshrl.u32 %v990_v59, 16  ;;  %v975_v31 = vxor.u32 %v971_v9, %v967_v45  ;;  %v2981_v33 = vor.u32 %v1442_v10, %v1441_v2 }
  0x60   : > { %v1209_v13 = vadd.s32 1, %v1205_v63  ;;  %v2983_v0 = vor.u32 %v1445_v1, %v1444_v11  ;;  %v1429_v34 = vor.u32 8388608, %v1428_v58  ;;  %v1452_v36 = vor.u32 %v1451_v18, %v1450_v17 }
  0x61   : > { %vm1208_vm11 = vc.u32 %v2959_v61, %v2954_v55  ;;  %vm1453_vm12 = vcmp.lt.s32.totalorder %v2973_v15, 1  ;;  %vm1456_vm13 = vcmp.lt.s32.totalorder %v2973_v15, 4  ;;  %v2987_v30 = vor.u32 %v1439_v23, %v1438_v21 }
  0x62   : > { %v1210_v25 = vsel %vm1208_vm11, %v1209_v13, %v1205_v63  ;;  %vm1455_vm14 = vcmp.lt.s32.totalorder %v2973_v15, 3  ;;  %v1462_v24 = vsel %vm1456_vm13, %v1449_v27, 920167782  ;;  %v979_v35 = vmul.u32 2221713035, %v975_v31 }
  0x63   : > { %v1211_v29 = vadd.s32 %v1210_v25, %v1206_v62  ;;  %v2661_v38 = vpop.eup %2660  ;;  %vm1454_vm15 = vcmp.lt.s32.totalorder %v2973_v15, 2  ;;  %v1465_v40 = vsel %vm1453_vm12, %v2981_v33, %v2983_v0  ;;  %v1466_v41 = vsel %vm1456_vm13, %v1452_v36, 1326507024 }
  0x64   : > { %v3001_v42 = vshll.u32 %v1429_v34, 8  ;;  %v998_v26 = vxor.u32 %v994_v28, %v990_v59  ;;  %v1461_v44 = vsel %vm1453_vm12, %v2987_v30, %v2981_v33  ;;  %v1463_v45 = vsel %vm1455_vm14, %v2983_v0, %v1462_v24 }
  0x65   : > { %v1212_v37 = vadd.s32 536870912, %v1211_v29  ;;  %v1467_v47 = vsel %vm1455_vm14, %v1449_v27, %v1466_v41  ;;  %v1054_v49 = vmul.f32 0.6931472, %v2661_v38  ;;  %v983_v59 = vshrl.u32 %v979_v35, 16 }
  0x66   : > { %v1468_v50 = vsel %vm1454_vm15, %v1465_v40, %v1467_v47  ;;  %v1470_v54 = vand.u32 65535, %v3001_v42  ;;  %v1471_v57 = vshrl.u32 %v3001_v42, 16  ;;  %v1464_v9 = vsel %vm1454_vm15, %v1461_v44, %v1463_v45 }
  0x67   : > { %v2992_v39 = vshrl.u32 %v1212_v37, 30  ;;  %v1472_v60 = vand.u32 65535, %v1468_v50  ;;  %v1473_v62 = vshrl.u32 %v1468_v50, 16  ;;  %v1002_v63 = vmul.u32 2146121005, %v998_v26 }
  0x68   : > { %v3019_v10 = vmul.f32 -2.0, %v1054_v49  ;;  %v987_v13 = vxor.u32 %v983_v59, %v979_v35  ;;  %v1495_v18 = vshrl.u32 %v1464_v9, 16  ;;  %v1207_v37 = vadd.s32 %v2954_v55, %v2959_v61 }
  0x69   : > { %v1214_v43 = vshll.u32 %v2992_v39, 30  ;;  %v1474_v6 = vmul.u32 %v1472_v60, %v1470_v54  ;;  %v1475_v7 = vmul.u32 %v1473_v62, %v1470_v54  ;;  %v3021_v11 = vmul.u32 %v1472_v60, %v1471_v57 }
  0x6a   : > { %v1006_v27 = vshrl.u32 %v1002_v63, 15  ;;  %2662 = vrsqrt.f32 %v3019_v10  ;;  %v1027_v31 = vshrl.u32 %v987_v13, 8  ;;  %v1477_v34 = vmul.u32 %v1473_v62, %v1471_v57 }
  0x6b   : > { %v1215_v58 = vsub.s32 %v1211_v29, %v1214_v43  ;;  %v1478_v17 = vshll.u32 %v1475_v7, 16  ;;  %v1480_v23 = vshll.u32 %v3021_v11, 16  ;;  %v1494_v29 = vand.u32 65535, %v1464_v9 }
  0x6c   : > { %v1497_v36 = vmul.u32 %v1495_v18, %v1470_v54  ;;  %v3028_v35 = vxor.u32 %v1006_v27, %v1002_v63  ;;  %v1031_v44 = vcvt.s32.f32 %v1027_v31  ;;  %v1437_v61 = vshrl.u32 %v4061_v12, %v2952_v52 }
  0x6d   : > { %vm1216_vm0 = vcmp.lt.s32.totalorder %v1215_v58, 0  ;;  %v1217_v2 = vsub.s32 0, %v1215_v58  ;;  %vm1482_vm1 = vc.u32 %v1474_v6, %v1478_v17  ;;  %v1484_v25 = vadd.s32 %v1478_v17, %v1474_v6 }
  0x6e   : > { %v1483_v24 = vsel %vm1482_vm1, 1, %v2740_v8  ;;  %v1498_v43 = vmul.u32 %v1494_v29, %v1471_v57  ;;  %v1496_v47 = vmul.u32 %v1494_v29, %v1470_v54  ;;  %v1500_v49 = vshll.u32 %v1497_v36, 16 }
  0x6f   : > { %v1218_v1 = vsel %vm1216_vm0, %v1217_v2, %v1215_v58  ;;  %vm1486_vm3 = vc.u32 %v1484_v25, %v1480_v23  ;;  %v1485_v45 = vadd.s32 %v1483_v24, %v1477_v34  ;;  %v1479_v62 = vshrl.u32 %v1475_v7, 16 }
  0x70   : > { %v1219_v21 = vclz %v1218_v1  ;;  %v3030_v50 = vpop.eup %2662  ;;  %v1487_v55 = vsel %vm1486_vm3, 1, %v2740_v8  ;;  %v1499_v9 = vmul.u32 %v1495_v18, %v1471_v57  ;;  %v1014_v63 = vmul.u32 2221713035, %v3028_v35 }
  0x71   : > { %v1458_v54 = vsel %vm1456_vm13, %v2983_v0, 2102212464  ;;  %v1502_v6 = vshll.u32 %v1498_v43, 16  ;;  %v1066_v1 = vmul.f32 %v3030_v50, %v3019_v10  ;;  %v1035_v13 = vadd.f32 1.0, %v1031_v44 }
  0x72   : > { %v2573_v28 = vadd.s32 4294967294, %v1219_v21  ;;  %v1489_v17 = vadd.s32 %v1487_v55, %v1485_v45  ;;  %vm1504_vm4 = vc.u32 %v1496_v47, %v1500_v49  ;;  %v1506_v57 = vadd.s32 %v1500_v49, %v1496_v47 }
  0x73   : > { %v1505_v52 = vsel %vm1504_vm4, 1, %v2740_v8  ;;  %v1457_v7 = vsel %vm1453_vm12, %v1437_v61, %v2987_v30  ;;  %v1481_v18 = vshrl.u32 %v3021_v11, 16  ;;  %v1501_v29 = vshrl.u32 %v1497_v36, 16 }
  0x74   : > { %vm2574_vm2 = vcmp.lt.s32.totalorder %v2573_v28, 0  ;;  %v1490_v25 = vadd.s32 %v1489_v17, %v1479_v62  ;;  %v1507_v0 = vadd.s32 %v1505_v52, %v1499_v9  ;;  %vm1508_vm5 = vc.u32 %v1506_v57, %v1502_v6 }
  0x75   : > { %v1222_v38 = vsel %vm2574_vm2, 0, %v2573_v28  ;;  %v1459_v28 = vsel %vm1455_vm14, %v2981_v33, %v1458_v54  ;;  %v1067_v31 = vmul.f32 %v3030_v50, %v1066_v1  ;;  %v1237_v34 = vsub.s32 4, %v2992_v39 }
  0x76   : > { %v1223_v40 = vsub.s32 32, %v1222_v38  ;;  %v1224_v41 = vshll.u32 %v1215_v58, %v1222_v38  ;;  %v1227_v26 = vsub.s32 4294967266, %v1222_v38  ;;  %v1509_v24 = vsel %vm1508_vm5, 1, %v2740_v8 }
  0x77   : > { %v1503_v30 = vshrl.u32 %v1498_v43, 16  ;;  %v1511_v35 = vadd.s32 %v1509_v24, %v1507_v0  ;;  %v3053_v11 = vadd.s32 %v1490_v25, %v1481_v18  ;;  %vm1114_vm7 = vcmp.le.f32.partialorder %v1113_v51, 0.7853982 }
  0x78   : > { %v1225_v59 = vshrl.u32 %v1207_v37, %v1223_v40  ;;  %v1228_v60 = vadd.s32 127, %v1227_v26  ;;  %v1039_v37 = vmul.f32 5.9604645e-08, %v1035_v13  ;;  %v3055_v40 = vadd.s32 %v1506_v57, %v1502_v6 }
  0x79   : > { %v1460_v36 = vsel %vm1454_vm15, %v1457_v7, %v1459_v28  ;;  %v1512_v26 = vadd.s32 %v1511_v35, %v1501_v29  ;;  %v1068_v44 = vmul.f32 0.5, %v1067_v31  ;;  %v1238_v45 = vsel %vm1115_vm6, %v1237_v34, %v2992_v39 }
  0x7a   : > { %v1226_v58 = vor.u32 %v1225_v59, %v1224_v41  ;;  %v1229_v2 = vshll.u32 %v1228_v60, 23  ;;  %v1018_v41 = vshrl.u32 %v1014_v63, 16  ;;  %2664 = vlog2.f32 %v1039_v37 }
  0x7b   : > { %v1513_v47 = vadd.s32 %v1512_v26, %v1503_v30  ;;  %v1514_v59 = vmul.u32 %v3001_v42, %v1460_v36  ;;  %vm1516_vm8 = vc.u32 %v3053_v11, %v3055_v40  ;;  %v1240_v60 = vsel %vm1114_vm7, 0, %v1238_v45 }
  0x7c   : > { %v1230_v21 = vor.u32 4788187, %v1229_v2  ;;  %v1233_v23 = vcvt.s32.f32 %v1226_v58  ;;  %v1022_v61 = vxor.u32 %v1018_v41, %v1014_v63  ;;  %v1069_v15 = vsub.f32 1.5, %v1068_v44 }
  0x7d   : > { %v1517_v55 = vadd.s32 1, %v1513_v47  ;;  %v1877_v39 = vadd.s32 3, %v1240_v60  ;;  %vm1072_vm9 = vcmp.eq.f32.partialorder %v3019_v10, inf  ;;  %vm1074_vm13 = vcmp.eq.f32.partialorder %v3019_v10, 0.0 }
  0x7e   : > { %v1231_v27 = vand.u32 2147483647, %v1230_v21  ;;  %v1042_v13 = vshrl.u32 %v1022_v61, 8  ;;  %v1070_v17 = vmul.f32 %v3030_v50, %v1069_v15  ;;  %v1075_v50 = vand.u32 2147483648, %v3019_v10 }
  0x7f   : > { %v1518_v58 = vsel %vm1516_vm8, %v1517_v55, %v1513_v47  ;;  %v1878_v57 = vand.u32 3, %v1877_v39  ;;  %vm1256_vm2 = vweird.f32 %v2886_v48  ;;  %vm1423_vm5 = vcmp.lt.s32.totalorder %v2891_v53, 0 }
  0x80   : > { %v1234_v38 = vmul.f32 %v1233_v23, %v1231_v27  ;;  %v2665_v2 = vpop.eup %2664  ;;  %v1519_v54 = vadd.s32 %v1518_v58, %v1514_v59  ;;  %v1046_v25 = vcvt.s32.f32 %v1042_v13  ;;  %v1071_v0 = vmul.f32 %v1070_v17, %v3019_v10 }
  0x81   : > { %v1058_v52 = vmul.f32 0.6931472, %v2665_v2  ;;  %vm1880_vm10 = vcmp.eq.s32.totalorder %v1878_v57, 0  ;;  %vm1883_vm11 = vcmp.eq.s32.totalorder %v1878_v57, 2  ;;  %vm1879_vm15 = vcmp.lt.s32.totalorder %v1878_v57, 2 }
  0x82   : > { %v1235_v33 = vxor.u32 2147483648, %v1234_v38  ;;  %v1520_v42 = vadd.s32 536870912, %v1519_v54  ;;  %v3075_v30 = vmul.f32 3.7450704e-07, %v1046_v25  ;;  %v1073_v35 = vsel %vm1072_vm9, %v3019_v10, %v1071_v0 }
  0x83   : > { %v3072_v31 = vmul.f32 -2.0, %v1058_v52 }
  0x84   : > { %v1236_v43 = vsel %vm1115_vm6, %v1235_v33, %v1234_v38  ;;  %v3067_v7 = vshrl.u32 %v1520_v42, 30  ;;  %v1257_v38 = vand.u32 3, %v1240_v60  ;;  %v958_v33 = vshrl.u32 %v2926_v46, 16 }
  0x85   : > { %v1239_v49 = vsel %vm1114_vm7, %v2886_v48, %v1236_v43  ;;  %2666 = vrsqrt.f32 %v3072_v31  ;;  %v1270_v47 = vand.u32 2139095040, %v3075_v30  ;;  %vm3102_vm6 = vcmp.le.f32.partialorder %v1421_v56, 0.7853982 }
  0x86   : > { %v1241_v51 = vmul.f32 %v1239_v49, %v1239_v49  ;;  %v1522_v27 = vshll.u32 %v3067_v7, 30  ;;  %vm1262_vm14 = vcmp.eq.s32.totalorder %v1257_v38, 2  ;;  %vm1259_vm0 = vcmp.eq.s32.totalorder %v1257_v38, 0 }
  0x87   : > { %vm1258_vm1 = vcmp.lt.s32.totalorder %v1257_v38, 2  ;;  %v1271_v39 = vshrl.u32 %v1270_v47, 23  ;;  %vm1096_vm7 = vcmp.eq.f32.partialorder %v3072_v31, inf  ;;  %vm1098_vm8 = vcmp.eq.f32.partialorder %v3072_v31, 0.0 }
  0x88   : > { %v1242_v62 = vmul.f32 -0.001358992, %v1241_v51  ;;  %v1249_v9 = vmul.f32 -0.00019511016, %v1241_v51  ;;  %v1523_v34 = vsub.s32 %v1519_v54, %v1522_v27 }
  0x8a   : > { %v1243_v6 = vadd.f32 0.041655596, %v1242_v62  ;;  %v1250_v1 = vadd.f32 0.008332121, %v1249_v9  ;;  %vm1524_vm12 = vcmp.lt.s32.totalorder %v1523_v34, 0  ;;  %v1525_v41 = vsub.s32 0, %v1523_v34 }
  0x8b   : > { %v2667_v48 = vpop.eup %2666 }
  0x8c   : > { %v1244_v21 = vmul.f32 %v1243_v6, %v1241_v51  ;;  %v1251_v23 = vmul.f32 %v1250_v1, %v1241_v51  ;;  %v1526_v44 = vsel %vm1524_vm12, %v1525_v41, %v1523_v34 }
  0x8d   : > { %v1527_v43 = vclz %v1526_v44 }
  0x8e   : > { %v1245_v63 = vadd.f32 -0.4999988, %v1244_v21  ;;  %v1252_v18 = vadd.f32 -0.16666654, %v1251_v23  ;;  %v2575_v21 = vadd.s32 4294967169, %v1271_v39  ;;  %v1090_v23 = vmul.f32 %v2667_v48, %v3072_v31 }
  0x8f   : > { %v2579_v15 = vadd.s32 4294967294, %v1527_v43 }
  0x90   : > { %v1246_v28 = vmul.f32 %v1245_v63, %v1241_v51  ;;  %v1253_v29 = vmul.f32 %v1252_v18, %v1241_v51  ;;  %v962_v51 = vxor.u32 %v958_v33, %v2926_v46  ;;  %v1515_v46 = vadd.s32 %v3055_v40, %v3053_v11 }
  0x91   : > { %vm2580_vm3 = vcmp.lt.s32.totalorder %v2579_v15, 0  ;;  %v1277_v0 = vadd.s32 1, %v2575_v21  ;;  %v932_v11 = vadd.s32 24, %v2845_v4  ;;  %v1091_v40 = vmul.f32 %v2667_v48, %v1090_v23 }
  0x92   : > { %v1247_v37 = vadd.f32 1.0, %v1246_v28  ;;  %v1254_v24 = vadd.f32 1.0, %v1253_v29  ;;  %v966_v10 = vmul.u32 2146121005, %v962_v51  ;;  %v1530_v1 = vsel %vm2580_vm3, 0, %v2579_v15 }
  0x93   : > { %v1531_v13 = vsub.s32 32, %v1530_v1  ;;  %v1532_v17 = vshll.u32 %v1523_v34, %v1530_v1  ;;  %v1535_v42 = vsub.s32 4294967266, %v1530_v1  ;;  %vm1278_vm4 = vcmp.gt.s32.totalorder %v1277_v0, 0 }
  0x94   : > { %v1255_v36 = vmul.f32 %v1254_v24, %v1239_v49  ;;  %v1263_v26 = vxor.u32 2147483648, %v1247_v37  ;;  %v1076_v49 = vsel %vm1074_vm13, %v1075_v50, %v1073_v35  ;;  %v970_v57 = vshrl.u32 %v966_v10, 15 }
  0x95   : > { %v1533_v52 = vshrl.u32 %v1515_v46, %v1531_v13  ;;  %v1536_v63 = vadd.s32 127, %v1535_v42  ;;  %v939_v34 = vadd.s32 %v2843_v3, %v932_v11  ;;  %v1092_v24 = vmul.f32 0.5, %v1091_v40 }
  0x96   : > { %v1260_v45 = vxor.u32 2147483648, %v1255_v36  ;;  %v1264_v59 = vsel %vm1262_vm14, %v1263_v26, %v1255_v36  ;;  %v1885_v60 = vsel %vm1883_vm11, %v1263_v26, %v1255_v36  ;;  %v974_v27 = vxor.u32 %v970_v57, %v966_v10 }
  0x97   : > { %v1534_v18 = vor.u32 %v1533_v52, %v1532_v17  ;;  %v1537_v25 = vshll.u32 %v1536_v63, 23  ;;  %v1279_v41 = vsel %vm1278_vm4, %v1277_v0, 0  ;;  %v1267_v36 = vand.u32 2147483647, %v3075_v30 }
  0x98   : > { %v1261_v55 = vsel %vm1259_vm0, %v1247_v37, %v1260_v45  ;;  %v1882_v61 = vsel %vm1880_vm10, %v1247_v37, %v1260_v45  ;;  %v2379_v37 = vld [vmem:[%s2864_s19 + $0x8] sm:$0xff]  ;;  %v978_v38 = vmul.u32 2221713035, %v974_v27  ;;  %v943_v4 = vmul.u32 64, %v939_v34 }
  0x99   : > { %v1265_v62 = vsel %vm1258_vm1, %v1261_v55, %v1264_v59  ;;  %v1886_v9 = vsel %vm1879_vm15, %v1882_v61, %v1885_v60  ;;  %v1538_v28 = vor.u32 4788187, %v1537_v25  ;;  %v1541_v29 = vcvt.s32.f32 %v1534_v18  ;;  %2389 = vperm.xlu2 %2657, %v2379_v37  }
  0x9a   : > { %v1266_v58 = vsel %vm1256_vm2, nan, %v1265_v62  ;;  %v1887_v2 = vsel %vm1256_vm2, nan, %v1886_v9  ;;  %v1093_v26 = vsub.f32 1.5, %v1092_v24  ;;  %v1545_v3 = vsub.s32 4, %v3067_v7 }
  0x9b   : > { %v3089_v54 = vmul.f32 %v1266_v58, %v1076_v49  ;;  %v2353_v6 = vmul.f32 %v1887_v2, %v1076_v49  ;;  %v1539_v50 = vand.u32 2147483647, %v1538_v28  ;;  %v982_v45 = vshrl.u32 %v978_v38, 16 }
  0x9c   : > { %v1281_v43 = vand.u32 31, %v1279_v41  ;;  %v3112_v60 = vand.u32 8388607, %v1267_v36  ;;  %v947_v51 = vadd.s32 %v943_v4, %v2847_v5  ;;  %v1094_v49 = vmul.f32 %v2667_v48, %v1093_v26 }
  0x9d   : > { %2361 = vrot.lane.b32.xlu0 %v2353_v6, %s2747_s26  ;;  %v1542_v35 = vmul.f32 %v1541_v29, %v1539_v50  ;;  %v1546_v56 = vsel %vm1423_vm5, %v1545_v3, %v3067_v7  ;;  %v986_v61 = vxor.u32 %v982_v45, %v978_v38  ;;  %v1099_v62 = vand.u32 2147483648, %v3072_v31 }
  0x9e   : > { %v3116_v15 = vsub.s32 32, %v1281_v43  ;;  %v1548_v58 = vsel %vm3102_vm6, 0, %v1546_v56  ;;  %v1275_v39 = vor.u32 8388608, %v3112_v60  ;;  %v951_v6 = vmul.u32 2, %v947_v51 }
  0x9f   : > { %v1543_v33 = vxor.u32 2147483648, %v1542_v35  ;;  %v1095_v5 = vmul.f32 %v1094_v49, %v3072_v31  ;;  %v1026_v7 = vshrl.u32 %v986_v61, 8  ;;  %v3124_v46 = vshrl.u32 %v1279_v41, 5 }
  0xa0   : > { %v1284_v1 = vshll.u32 %v4061_v12, %v1281_v43  ;;  %v1293_v13 = vshll.u32 %v4060_v19, %v1281_v43  ;;  %v1294_v17 = vshrl.u32 %v2745_v22, %v3116_v15  ;;  %v2187_v21 = vadd.s32 3, %v1548_v58 }
  0xa1   : > { %v1544_v47 = vsel %vm1423_vm5, %v1543_v33, %v1542_v35  ;;  %v1296_v23 = vshll.u32 %v2745_v22, %v1281_v43  ;;  %v1297_v52 = vshrl.u32 %v2746_v32, %v3116_v15  ;;  %v1285_v63 = vshrl.u32 %v2742_v14, %v3116_v15 }
  0xa2   : > { %v1547_v59 = vsel %vm3102_vm6, %v2891_v53, %v1544_v47  ;;  %v1287_v18 = vshll.u32 %v2742_v14, %v1281_v43  ;;  %v1288_v25 = vshrl.u32 %v4063_v16, %v3116_v15  ;;  %v1565_v11 = vand.u32 3, %v1548_v58 }
  0xa3   : > { %v1549_v55 = vmul.f32 %v1547_v59, %v1547_v59  ;;  %v1290_v40 = vshll.u32 %v4063_v16, %v1281_v43  ;;  %v1291_v27 = vshrl.u32 %v4060_v19, %v3116_v15  ;;  %v1097_v28 = vsel %vm1096_vm7, %v3072_v31, %v1095_v5 }
  0xa4   : > { %v1295_v50 = vor.u32 %v1294_v17, %v1293_v13  ;;  %v3146_v37 = vadd.s32 %v2877_v20, %v951_v6  ;;  %v2188_v24 = vand.u32 3, %v2187_v21  ;;  %v1298_v38 = vor.u32 %v1297_v52, %v1296_v23 }
  0xa5   : > { %v1550_v9 = vmul.f32 -0.001358992, %v1549_v55  ;;  %v1557_v2 = vmul.f32 -0.00019511016, %v1549_v55  ;;  %vm1302_vm9 = vcmp.lt.s32.totalorder %v3124_v46, 4  ;;  %v1030_v41 = vcvt.s32.f32 %v1026_v7 }
  0xa6   : > { %v3149_v33 = vor.u32 %v1285_v63, %v1284_v1  ;;  %v3151_v4 = vor.u32 %v1288_v25, %v1287_v18  ;;  %vm1566_vm10 = vcmp.lt.s32.totalorder %v1565_v11, 2  ;;  %vm1567_vm11 = vcmp.eq.s32.totalorder %v1565_v11, 0 }
  0xa7   : > { %v1551_v48 = vadd.f32 0.041655596, %v1550_v9  ;;  %v1558_v10 = vadd.f32 0.008332121, %v1557_v2  ;;  %v1292_v44 = vor.u32 %v1291_v27, %v1290_v40  ;;  %vm1299_vm12 = vcmp.lt.s32.totalorder %v3124_v46, 1 }
  0xa8   : > { %vm1301_vm13 = vcmp.lt.s32.totalorder %v3124_v46, 3  ;;  %v1308_v20 = vsel %vm1302_vm9, %v1295_v50, 920167782  ;;  %vm1570_vm14 = vcmp.eq.s32.totalorder %v1565_v11, 2  ;;  %vm2193_vm15 = vcmp.eq.s32.totalorder %v2188_v24, 2 }
  0xa9   : > { %v1552_v42 = vmul.f32 %v1551_v48, %v1549_v55  ;;  %v1559_v57 = vmul.f32 %v1558_v10, %v1549_v55  ;;  %v1312_v43 = vsel %vm1302_vm9, %v1298_v38, 1326507024  ;;  %vm2189_vm0 = vcmp.lt.s32.totalorder %v2188_v24, 2 }
  0xaa   : > { %vm2190_vm1 = vcmp.eq.s32.totalorder %v2188_v24, 0  ;;  %vm1300_vm2 = vcmp.lt.s32.totalorder %v3124_v46, 2  ;;  %v1307_v60 = vsel %vm1299_vm12, %v3149_v33, %v3151_v4  ;;  %v1309_v51 = vsel %vm1301_vm13, %v1292_v44, %v1308_v20 }
  0xab   : > { %v1553_v0 = vadd.f32 -0.4999988, %v1552_v42  ;;  %v1560_v29 = vadd.f32 -0.16666654, %v1559_v57  ;;  %v1311_v49 = vsel %vm1299_vm12, %v3151_v4, %v1292_v44  ;;  %v3169_v56 = vshll.u32 %v1275_v39, 8 }
  0xac   : > { %v1313_v9 = vsel %vm1301_vm13, %v1295_v50, %v1312_v43  ;;  %vm1564_vm3 = vweird.f32 %v2891_v53  ;;  %v992_v58 = vadd.s32 1, %v3146_v37  ;;  %v1100_v2 = vsel %vm1098_vm8, %v1099_v62, %v1097_v28 }
  0xad   : > { %v1554_v34 = vmul.f32 %v1553_v0, %v1549_v55  ;;  %v1561_v35 = vmul.f32 %v1560_v29, %v1549_v55  ;;  %v1034_v39 = vadd.f32 1.0, %v1030_v41  ;;  %v1310_v10 = vsel %vm1300_vm2, %v1307_v60, %v1309_v51 }
  0xae   : > { %v1314_v53 = vsel %vm1300_vm2, %v1311_v49, %v1313_v9  ;;  %v1316_v17 = vand.u32 65535, %v3169_v56  ;;  %v1317_v31 = vshrl.u32 %v3169_v56, 16  ;;  %v1340_v57 = vand.u32 65535, %v1310_v10 }
  0xaf   : > { %v1555_v26 = vadd.f32 1.0, %v1554_v34  ;;  %v1562_v3 = vadd.f32 1.0, %v1561_v35  ;;  %v1318_v21 = vand.u32 65535, %v1314_v53  ;;  %v1319_v23 = vshrl.u32 %v1314_v53, 16 }
  0xb0   : > { %v1038_v52 = vmul.f32 5.9604645e-08, %v1034_v39  ;;  %v1341_v63 = vshrl.u32 %v1310_v10, 16  ;;  %v996_v18 = vshrl.u32 %v992_v58, 16  ;;  %v1283_v25 = vshrl.u32 %v4061_v12, %v3116_v15 }
  0xb1   : > { %v1571_v45 = vxor.u32 2147483648, %v1555_v26  ;;  %v1563_v47 = vmul.f32 %v1562_v3, %v1547_v59  ;;  %v1320_v0 = vmul.u32 %v1318_v21, %v1316_v17  ;;  %v1321_v11 = vmul.u32 %v1319_v23, %v1316_v17 }
  0xb2   : > { %v1322_v40 = vmul.u32 %v1318_v21, %v1317_v31  ;;  %v1342_v27 = vmul.u32 %v1340_v57, %v1316_v17  ;;  %v1343_v28 = vmul.u32 %v1341_v63, %v1316_v17  ;;  %v1344_v29 = vmul.u32 %v1340_v57, %v1317_v31 }
  0xb3   : > { %v1568_v55 = vxor.u32 2147483648, %v1563_v47  ;;  %v1572_v59 = vsel %vm1570_vm14, %v1571_v45, %v1563_v47  ;;  %v2195_v61 = vsel %vm2193_vm15, %v1571_v45, %v1563_v47  ;;  %v1304_v50 = vsel %vm1302_vm9, %v1292_v44, 2102212464 }
  0xb4   : > { %v1323_v34 = vmul.u32 %v1319_v23, %v1317_v31  ;;  %v1324_v24 = vshll.u32 %v1321_v11, 16  ;;  %v1326_v38 = vshll.u32 %v1322_v40, 16  ;;  %2668 = vlog2.f32 %v1038_v52 }
  0xb5   : > { %v1569_v6 = vsel %vm1567_vm11, %v1555_v26, %v1568_v55  ;;  %v2192_v5 = vsel %vm2190_vm1, %v1555_v26, %v1568_v55  ;;  %v1345_v35 = vmul.u32 %v1341_v63, %v1317_v31  ;;  %v1346_v41 = vshll.u32 %v1343_v28, 16 }
  0xb6   : > { %v1573_v48 = vsel %vm1566_vm10, %v1569_v6, %v1572_v59  ;;  %v2196_v7 = vsel %vm2189_vm0, %v2192_v5, %v2195_v61  ;;  %v1000_v26 = vxor.u32 %v996_v18, %v992_v58  ;;  %v1303_v15 = vsel %vm1299_vm12, %v1283_v25, %v3149_v33 }
  0xb7   : > { %v1574_v1 = vsel %vm1564_vm3, nan, %v1573_v48  ;;  %v2197_v13 = vsel %vm1564_vm3, nan, %v2196_v7  ;;  %vm1328_vm4 = vc.u32 %v1320_v0, %v1324_v24  ;;  %v1330_v3 = vadd.s32 %v1324_v24, %v1320_v0  ;;  %v284_v24 = vpop.f32.mrf.mxu1 }
  0xb8   : > { %v3188_v62 = vmul.f32 %v1574_v1, %v1100_v2  ;;  %v2355_v42 = vmul.f32 %v2197_v13, %v1100_v2  ;;  %v1348_v20 = vshll.u32 %v1344_v29, 16  ;;  %v1305_v45 = vsel %vm1301_vm13, %v3151_v4, %v1304_v50 }
  0xb9   : > { %v1329_v44 = vsel %vm1328_vm4, 1, %v2740_v8  ;;  %vm1350_vm5 = vc.u32 %v1342_v27, %v1346_v41  ;;  %v1352_v43 = vadd.s32 %v1346_v41, %v1342_v27  ;;  %v1325_v47 = vshrl.u32 %v1321_v11, 16  ;;  %v281_v27 = vpop.f32.mrf.mxu0 }
  0xba   : > { %2365 = vrot.lane.b32.xlu1 %v2355_v42, %s2747_s26  ;;  %v1331_v60 = vadd.s32 %v1329_v44, %v1323_v34  ;;  %vm1332_vm6 = vc.u32 %v1330_v3, %v1326_v38  ;;  %v1351_v51 = vsel %vm1350_vm5, 1, %v2740_v8  ;;  %v1347_v55 = vshrl.u32 %v1343_v28, 16  ;;  %v2669_v4 = vpop.eup %2668 }
  0xbb   : > { %v1333_v49 = vsel %vm1332_vm6, 1, %v2740_v8  ;;  %v1353_v33 = vadd.s32 %v1351_v51, %v1345_v35  ;;  %vm1354_vm7 = vc.u32 %v1352_v43, %v1348_v20  ;;  %v1327_v59 = vshrl.u32 %v1322_v40, 16 }
  0xbc   : > { %v1335_v61 = vadd.s32 %v1333_v49, %v1331_v60  ;;  %v1355_v9 = vsel %vm1354_vm7, 1, %v2740_v8  ;;  %v1004_v58 = vmul.u32 2146121005, %v1000_v26  ;;  %v1349_v2 = vshrl.u32 %v1344_v29, 16 }
  0xbd   : > { %v1357_v6 = vadd.s32 %v1355_v9, %v1353_v33  ;;  %v1356_v39 = vadd.s32 %v1352_v43, %v1348_v20  ;;  %v960_v48 = vshrl.u32 %v3146_v37, 16  ;;  %v1306_v10 = vsel %vm1300_vm2, %v1303_v15, %v1305_v45 }
  0xbe   : > { %v1336_v5 = vadd.s32 %v1335_v61, %v1325_v47  ;;  %v1008_v7 = vshrl.u32 %v1004_v58, 15  ;;  %v1056_v1 = vmul.f32 0.6931472, %v2669_v4  ;;  %v1360_v42 = vmul.u32 %v3169_v56, %v1306_v10 }
  0xbf   : > { %v1358_v53 = vadd.s32 %v1357_v6, %v1347_v55  ;;  %v964_v21 = vxor.u32 %v960_v48, %v3146_v37  ;;  %v293_v37 = vfloor.f32 %v281_v27  ;;  %v294_v15 = vfloor.f32 %v284_v24 }
  0xc0   : > { %v1337_v13 = vadd.s32 %v1336_v5, %v1327_v59  ;;  %v1012_v17 = vxor.u32 %v1008_v7, %v1004_v58  ;;  %v3210_v57 = vmul.f32 -2.0, %v1056_v1  ;;  %vm1269_vm10 = vcmp.lt.s32.totalorder %v3075_v30, 0 }
  0xc1   : > { %v1359_v31 = vadd.s32 %v1358_v53, %v1349_v2  ;;  %v968_v0 = vmul.u32 2146121005, %v964_v21  ;;  %v297_v45 = vsub.f32 %v281_v27, %v293_v37  ;;  %v298_v33 = vsub.f32 %v284_v24, %v294_v15 }
  0xc2   : > { %vm1362_vm8 = vc.u32 %v1337_v13, %v1356_v39  ;;  %v1016_v23 = vmul.u32 2221713035, %v1012_v17  ;;  %2670 = vrsqrt.f32 %v3210_v57  ;;  %v1361_v6 = vadd.s32 %v1356_v39, %v1337_v13 }
  0xc3   : > { %v1363_v52 = vadd.s32 1, %v1359_v31  ;;  %v972_v29 = vshrl.u32 %v968_v0, 15  ;;  %v3221_v61 = vmul.f32 6.2831855, %v297_v45  ;;  %v3229_v7 = vmul.f32 6.2831855, %v298_v33 }
  0xc4   : > { %v1020_v63 = vshrl.u32 %v1016_v23, 16  ;;  %vm3233_vm13 = vcmp.le.f32.partialorder %v1267_v36, 0.7853982  ;;  %vm1084_vm2 = vcmp.eq.f32.partialorder %v3210_v57, inf }
  0xc5   : > { %v1364_v18 = vsel %vm1362_vm8, %v1363_v52, %v1359_v31  ;;  %v976_v41 = vxor.u32 %v972_v29, %v968_v0  ;;  %vm1086_vm8 = vcmp.eq.f32.partialorder %v3210_v57, 0.0 }
  0xc6   : > { %v1365_v25 = vadd.s32 %v1364_v18, %v1360_v42  ;;  %v1024_v46 = vxor.u32 %v1020_v63, %v1016_v23 }
  0xc7   : > { %v980_v47 = vmul.u32 2221713035, %v976_v41 }
  0xc8   : > { %v1366_v11 = vadd.s32 536870912, %v1365_v25  ;;  %v1044_v40 = vshrl.u32 %v1024_v46, 8  ;;  %v3215_v38 = vpop.eup %2670 }
  0xc9   : > { %v1078_v44 = vmul.f32 %v3215_v38, %v3210_v57  ;;  %v984_v4 = vshrl.u32 %v980_v47, 16 }
  0xca   : > { %v1367_v28 = vshrl.u32 %v1366_v11, 30  ;;  %v1048_v56 = vcvt.s32.f32 %v1044_v40 }
  0xcb   : > { %v1079_v9 = vmul.f32 %v3215_v38, %v1078_v44  ;;  %v988_v13 = vxor.u32 %v984_v4, %v980_v47 }
  0xcc   : > { %v1368_v50 = vshll.u32 %v1367_v28, 30  ;;  %v3213_v34 = vmul.f32 3.7450704e-07, %v1048_v56  ;;  %v1391_v55 = vsub.s32 4, %v1367_v28 }
  0xcd   : > { %v1080_v17 = vmul.f32 0.5, %v1079_v9 }
  0xce   : > { %v1369_v35 = vsub.s32 %v1365_v25, %v1368_v50  ;;  %v1578_v26 = vand.u32 2139095040, %v3213_v34  ;;  %v1575_v60 = vand.u32 2147483647, %v3213_v34  ;;  %v1392_v5 = vsel %vm1269_vm10, %v1391_v55, %v1367_v28 }
  0xcf   : > { %v3239_v39 = vsel %vm3233_vm13, 0, %v1392_v5 }
  0xd0   : > { %vm1370_vm9 = vcmp.lt.s32.totalorder %v1369_v35, 0  ;;  %v1371_v3 = vsub.s32 0, %v1369_v35  ;;  %v1579_v20 = vshrl.u32 %v1578_v26, 23  ;;  %v1582_v2 = vand.u32 8388607, %v1575_v60 }
  0xd2   : > { %v1372_v43 = vsel %vm1370_vm9, %v1371_v3, %v1369_v35  ;;  %v2581_v51 = vadd.s32 4294967169, %v1579_v20  ;;  %v1583_v23 = vor.u32 8388608, %v1582_v2  ;;  %v1028_v20 = vshrl.u32 %v988_v13, 8 }
  0xd3   : > { %v1373_v49 = vclz %v1372_v43 }
  0xd4   : > { %v1585_v59 = vadd.s32 1, %v2581_v51  ;;  %v3258_v44 = vshll.u32 %v1583_v23, 8  ;;  %v1081_v51 = vsub.f32 1.5, %v1080_v17  ;;  %v463_v23 = vand.u32 2139095040, %v3229_v7 }
  0xd5   : > { %v2576_v58 = vadd.s32 4294967294, %v1373_v49  ;;  %v1032_v49 = vcvt.s32.f32 %v1028_v20 }
  0xd6   : > { %vm1586_vm11 = vcmp.gt.s32.totalorder %v1585_v59, 0  ;;  %v1624_v5 = vand.u32 65535, %v3258_v44  ;;  %v1625_v17 = vshrl.u32 %v3258_v44, 16 }
  0xd7   : > { %vm2577_vm12 = vcmp.lt.s32.totalorder %v2576_v58, 0  ;;  %v1587_v48 = vsel %vm1586_vm11, %v1585_v59, 0  ;;  %v2032_v59 = vadd.s32 3, %v3239_v39  ;;  %v1036_v4 = vadd.f32 1.0, %v1032_v49 }
  0xd8   : > { %v1376_v53 = vsel %vm2577_vm12, 0, %v2576_v58  ;;  %v1589_v1 = vand.u32 31, %v1587_v48  ;;  %v3243_v0 = vshrl.u32 %v1587_v48, 5  ;;  %vm1410_vm12 = vweird.f32 %v3075_v30 }
  0xd9   : > { %v1377_v31 = vsub.s32 32, %v1376_v53  ;;  %v1378_v42 = vshll.u32 %v1369_v35, %v1376_v53  ;;  %v1381_v21 = vsub.s32 4294967266, %v1376_v53 }
  0xda   : > { %v1590_v52 = vsub.s32 32, %v1589_v1  ;;  %v1592_v36 = vshll.u32 %v4061_v12, %v1589_v1  ;;  %v1595_v25 = vshll.u32 %v2742_v14, %v1589_v1  ;;  %v1598_v40 = vshll.u32 %v4063_v16, %v1589_v1 }
  0xdb   : > { %v1379_v63 = vshrl.u32 %v1361_v6, %v1377_v31  ;;  %v1382_v18 = vadd.s32 127, %v1381_v21  ;;  %v1601_v56 = vshll.u32 %v4060_v19, %v1589_v1  ;;  %v1604_v35 = vshll.u32 %v2745_v22, %v1589_v1 }
  0xdc   : > { %v1593_v46 = vshrl.u32 %v2742_v14, %v1590_v52  ;;  %v1596_v11 = vshrl.u32 %v4063_v16, %v1590_v52  ;;  %v1599_v29 = vshrl.u32 %v4060_v19, %v1590_v52  ;;  %v1602_v24 = vshrl.u32 %v2745_v22, %v1590_v52 }
  0xdd   : > { %v1380_v27 = vor.u32 %v1379_v63, %v1378_v42  ;;  %v1383_v28 = vshll.u32 %v1382_v18, 23  ;;  %v1605_v3 = vshrl.u32 %v2746_v32, %v1590_v52  ;;  %vm1607_vm14 = vcmp.lt.s32.totalorder %v3243_v0, 1 }
  0xde   : > { %v3250_v50 = vor.u32 %v1593_v46, %v1592_v36  ;;  %v3252_v37 = vor.u32 %v1596_v11, %v1595_v25  ;;  %v1600_v15 = vor.u32 %v1599_v29, %v1598_v40  ;;  %v1603_v45 = vor.u32 %v1602_v24, %v1601_v56 }
  0xdf   : > { %v1384_v41 = vor.u32 4788187, %v1383_v28  ;;  %v1387_v26 = vcvt.s32.f32 %v1380_v27  ;;  %v1606_v47 = vor.u32 %v1605_v3, %v1604_v35  ;;  %vm1609_vm15 = vcmp.lt.s32.totalorder %v3243_v0, 3 }
  0xe0   : > { %vm1610_vm0 = vcmp.lt.s32.totalorder %v3243_v0, 4  ;;  %vm1608_vm1 = vcmp.lt.s32.totalorder %v3243_v0, 2  ;;  %v1615_v55 = vsel %vm1607_vm14, %v3250_v50, %v3252_v37  ;;  %v1619_v58 = vsel %vm1607_vm14, %v3252_v37, %v1600_v15 }
  0xe1   : > { %v1385_v43 = vand.u32 2147483647, %v1384_v41  ;;  %v1616_v9 = vsel %vm1610_vm0, %v1603_v45, 920167782  ;;  %v1620_v6 = vsel %vm1610_vm0, %v1606_v47, 1326507024  ;;  %v1082_v25 = vmul.f32 %v3215_v38, %v1081_v51 }
  0xe2   : > { %v1617_v2 = vsel %vm1609_vm15, %v1600_v15, %v1616_v9  ;;  %v1621_v1 = vsel %vm1609_vm15, %v1603_v45, %v1620_v6  ;;  %v308_v31 = vand.u32 2139095040, %v3221_v61  ;;  %v1040_v18 = vmul.f32 5.9604645e-08, %v1036_v4 }
  0xe3   : > { %v1388_v33 = vmul.f32 %v1387_v26, %v1385_v43  ;;  %v1618_v53 = vsel %vm1608_vm1, %v1615_v55, %v1617_v2  ;;  %v1622_v42 = vsel %vm1608_vm1, %v1619_v58, %v1621_v1  ;;  %v3295_v11 = vand.u32 3, %v2032_v59 }
  0xe4   : > { %v1648_v21 = vand.u32 65535, %v1618_v53  ;;  %v1649_v13 = vshrl.u32 %v1618_v53, 16  ;;  %v1626_v36 = vand.u32 65535, %v1622_v42  ;;  %v1627_v40 = vshrl.u32 %v1622_v42, 16 }
  0xe5   : > { %v1389_v48 = vxor.u32 2147483648, %v1388_v33  ;;  %v1591_v28 = vshrl.u32 %v4061_v12, %v1590_v52  ;;  %2672 = vlog2.f32 %v1040_v18  ;;  %v1612_v10 = vsel %vm1610_vm0, %v1600_v15, 2102212464 }
  0xe6   : > { %v1630_v29 = vmul.u32 %v1626_v36, %v1625_v17  ;;  %v1651_v56 = vmul.u32 %v1649_v13, %v1624_v5  ;;  %v1628_v24 = vmul.u32 %v1626_v36, %v1624_v5  ;;  %v1629_v35 = vmul.u32 %v1627_v40, %v1624_v5 }
  0xe7   : > { %v1390_v63 = vsel %vm1269_vm10, %v1389_v48, %v1388_v33  ;;  %v1650_v41 = vmul.u32 %v1648_v21, %v1624_v5  ;;  %v1652_v26 = vmul.u32 %v1648_v21, %v1625_v17  ;;  %v1631_v20 = vmul.u32 %v1627_v40, %v1625_v17 }
  0xe8   : > { %v3293_v46 = vsel %vm3233_vm13, %v3075_v30, %v1390_v63  ;;  %v1632_v45 = vshll.u32 %v1629_v35, 16  ;;  %v1634_v43 = vshll.u32 %v1630_v29, 16  ;;  %v1654_v47 = vshll.u32 %v1651_v56, 16 }
  0xe9   : > { %v1395_v27 = vmul.f32 %v3293_v46, %v3293_v46  ;;  %v1653_v49 = vmul.u32 %v1649_v13, %v1625_v17  ;;  %v1656_v55 = vshll.u32 %v1652_v26, 16  ;;  %v1633_v4 = vshrl.u32 %v1629_v35, 16 }
  0xea   : > { %vm1636_vm3 = vc.u32 %v1628_v24, %v1632_v45  ;;  %v1638_v33 = vadd.s32 %v1632_v45, %v1628_v24  ;;  %vm1658_vm4 = vc.u32 %v1650_v41, %v1654_v47  ;;  %v1660_v59 = vadd.s32 %v1654_v47, %v1650_v41 }
  0xeb   : > { %v1396_v38 = vmul.f32 -0.001358992, %v1395_v27  ;;  %v1403_v3 = vmul.f32 -0.00019511016, %v1395_v27  ;;  %v1637_v2 = vsel %vm1636_vm3, 1, %v2740_v8  ;;  %v1659_v6 = vsel %vm1658_vm4, 1, %v2740_v8  ;;  %v2673_v5 = vpop.eup %2672 }
  0xec   : > { %v1639_v15 = vadd.s32 %v1637_v2, %v1631_v20  ;;  %vm1640_vm5 = vc.u32 %v1638_v33, %v1634_v43  ;;  %vm1662_vm6 = vc.u32 %v1660_v59, %v1656_v55  ;;  %v1635_v1 = vshrl.u32 %v1630_v29, 16 }
  0xed   : > { %v1397_v51 = vadd.f32 0.041655596, %v1396_v38  ;;  %v1404_v52 = vadd.f32 0.008332121, %v1403_v3  ;;  %v1641_v17 = vsel %vm1640_vm5, 1, %v2740_v8  ;;  %v1655_v21 = vshrl.u32 %v1651_v56, 16 }
  0xee   : > { %v1643_v42 = vadd.s32 %v1641_v17, %v1639_v15  ;;  %v1661_v13 = vadd.s32 %v1659_v6, %v1653_v49  ;;  %v1663_v63 = vsel %vm1662_vm6, 1, %v2740_v8  ;;  %v1611_v40 = vsel %vm1607_vm14, %v1591_v28, %v3250_v50 }
  0xef   : > { %v1398_v9 = vmul.f32 %v1397_v51, %v1395_v27  ;;  %v1405_v58 = vmul.f32 %v1404_v52, %v1395_v27  ;;  %v1613_v24 = vsel %vm1609_vm15, %v3252_v37, %v1612_v10  ;;  %v1083_v35 = vmul.f32 %v1082_v25, %v3210_v57 }
  0xf0   : > { %v1644_v29 = vadd.s32 %v1643_v42, %v1633_v4  ;;  %v1657_v41 = vshrl.u32 %v1652_v26, 16  ;;  %v1665_v38 = vadd.s32 %v1663_v63, %v1661_v13  ;;  %vm2038_vm7 = vcmp.eq.s32.totalorder %v3295_v11, 2 }
  0xf1   : > { %v1399_v48 = vadd.f32 -0.4999988, %v1398_v9  ;;  %v1406_v53 = vadd.f32 -0.16666654, %v1405_v58  ;;  %v1664_v20 = vadd.s32 %v1660_v59, %v1656_v55  ;;  %v1614_v45 = vsel %vm1608_vm1, %v1611_v40, %v1613_v24 }
  0xf2   : > { %v1645_v50 = vadd.s32 %v1644_v29, %v1635_v1  ;;  %v1666_v28 = vadd.s32 %v1665_v38, %v1655_v21  ;;  %v1087_v37 = vand.u32 2147483648, %v3210_v57  ;;  %v1085_v10 = vsel %vm1084_vm2, %v3210_v57, %v1083_v35  ;;  %v290_v1 = vpop.f32.mrf.mxu3 }
  0xf3   : > { %v1400_v18 = vmul.f32 %v1399_v48, %v1395_v27  ;;  %v1407_v36 = vmul.f32 %v1406_v53, %v1395_v27  ;;  %v1060_v27 = vmul.f32 0.6931472, %v2673_v5  ;;  %vm2034_vm9 = vcmp.lt.s32.totalorder %v3295_v11, 2 }
  0xf4   : > { %vm2035_vm10 = vcmp.eq.s32.totalorder %v3295_v11, 0  ;;  %v1667_v0 = vadd.s32 %v1666_v28, %v1657_v41  ;;  %vm1670_vm11 = vc.u32 %v1645_v50, %v1664_v20  ;;  %v309_v51 = vshrl.u32 %v308_v31, 23 }
  0xf5   : > { %v3314_v3 = vadd.f32 1.0, %v1400_v18  ;;  %v1408_v56 = vadd.f32 1.0, %v1407_v36  ;;  %v3338_v52 = vmul.f32 -2.0, %v1060_v27  ;;  %v464_v11 = vshrl.u32 %v463_v23, 23 }
  0xf6   : > { %v1671_v49 = vadd.s32 1, %v1667_v0  ;;  %v3344_v55 = vsel %vm1086_vm8, %v1087_v37, %v1085_v10  ;;  %v2559_v58 = vadd.s32 4294967169, %v309_v51  ;;  %v296_v18 = vfloor.f32 %v290_v1 }
  0xf7   : > { %v3322_v25 = vmul.f32 %v1408_v56, %v3293_v46  ;;  %v4053_v26 = vxor.u32 2147483648, %v3314_v3  ;;  %v1668_v46 = vmul.u32 %v3258_v44, %v1614_v45  ;;  %2674 = vrsqrt.f32 %v3338_v52 }
  0xf8   : > { %v1672_v59 = vsel %vm1670_vm11, %v1671_v49, %v1667_v0  ;;  %v2562_v23 = vadd.s32 4294967169, %v464_v11  ;;  %v315_v15 = vadd.s32 1, %v2559_v58  ;;  %v300_v41 = vsub.f32 %v290_v1, %v296_v18  ;;  %v287_v58 = vpop.f32.mrf.mxu2 }
  0xf9   : > { %v4054_v43 = vxor.u32 2147483648, %v3322_v25  ;;  %v2040_v47 = vsel %vm2038_vm7, %v4053_v26, %v3322_v25  ;;  %v1673_v9 = vadd.s32 %v1672_v59, %v1668_v46  ;;  %v1669_v38 = vadd.s32 %v1664_v20, %v1645_v50 }
  0xfa   : > { %v470_v6 = vadd.s32 1, %v2562_v23  ;;  %vm316_vm13 = vcmp.gt.s32.totalorder %v315_v15, 0  ;;  %v3369_v51 = vmul.f32 6.2831855, %v300_v41  ;;  %vm1577_vm1 = vcmp.lt.s32.totalorder %v3213_v34, 0 }
  0xfb   : > { %v2037_v44 = vsel %vm2035_vm10, %v3314_v3, %v4054_v43  ;;  %v1674_v2 = vadd.s32 536870912, %v1673_v9  ;;  %v317_v21 = vsel %vm316_vm13, %v315_v15, 0  ;;  %vm3402_vm3 = vcmp.le.f32.partialorder %v1575_v60, 0.7853982 }
  0xfc   : > { %v2041_v33 = vsel %vm2034_vm9, %v2037_v44, %v2040_v47  ;;  %vm471_vm14 = vcmp.gt.s32.totalorder %v470_v6, 0  ;;  %v3355_v24 = vand.u32 31, %v317_v21  ;;  %v3362_v0 = vshrl.u32 %v317_v21, 5 }
  0xfd   : > { %v2042_v31 = vsel %vm1410_vm12, nan, %v2041_v33  ;;  %v1675_v57 = vshrl.u32 %v1674_v2, 30  ;;  %v2675_v48 = vpop.eup %2674  ;;  %v472_v63 = vsel %vm471_vm14, %v470_v6, 0  ;;  %v295_v21 = vfloor.f32 %v287_v58 }
  0xfe   : > { %v2354_v4 = vmul.f32 %v2042_v31, %v3344_v55  ;;  %v1102_v17 = vmul.f32 %v2675_v48, %v3338_v52  ;;  %v3357_v29 = vand.u32 31, %v472_v63  ;;  %v3360_v45 = vsub.s32 32, %v3355_v24 }
  0xff   : > { %v1676_v5 = vshll.u32 %v1675_v57, 30  ;;  %v3364_v47 = vshrl.u32 %v472_v63, 5  ;;  %v1699_v49 = vsub.s32 4, %v1675_v57  ;;  %v331_v11 = vshll.u32 %v4060_v19, %v3355_v24  ;;  %v2409_v63 = vld [vmem:[%s3381_s7 + $0x18] sm:$0xff] }
 0x100   : > { %2363 = vrot.lane.b32.xlu0 %v2354_v4, %s2747_s26  ;;  %v1103_v40 = vmul.f32 %v2675_v48, %v1102_v17  ;;  %v3367_v46 = vsub.s32 32, %v3357_v29  ;;  %v334_v44 = vshll.u32 %v2745_v22, %v3355_v24  ;;  %v486_v33 = vshll.u32 %v4060_v19, %v3357_v29 }
 0x101   : > { %v1677_v53 = vsub.s32 %v1673_v9, %v1676_v5  ;;  %v332_v31 = vshrl.u32 %v2745_v22, %v3360_v45  ;;  %v489_v9 = vshll.u32 %v2745_v22, %v3357_v29  ;;  %v335_v2 = vshrl.u32 %v2746_v32, %v3360_v45 }
 0x102   : > { %v1104_v56 = vmul.f32 0.5, %v1103_v40  ;;  %v487_v15 = vshrl.u32 %v2745_v22, %v3367_v46  ;;  %v490_v6 = vshrl.u32 %v2746_v32, %v3367_v46  ;;  %v773_v5 = vand.u32 2139095040, %v3369_v51 }
 0x103   : > { %vm1678_vm15 = vcmp.lt.s32.totalorder %v1677_v53, 0  ;;  %v1679_v42 = vsub.s32 0, %v1677_v53  ;;  %v1700_v17 = vsel %vm1577_vm1, %v1699_v49, %v1675_v57  ;;  %v333_v18 = vor.u32 %v332_v31, %v331_v11 }
 0x104   : > { %v1105_v59 = vsub.f32 1.5, %v1104_v56  ;;  %vm340_vm2 = vcmp.lt.s32.totalorder %v3362_v0, 4  ;;  %v3406_v41 = vor.u32 %v487_v15, %v486_v33  ;;  %v491_v57 = vor.u32 %v490_v6, %v489_v9  ;;  %v2408_v33 = vld [vmem:[%s3381_s7 + $0x10] sm:$0xff] }
 0x105   : > { %v1680_v13 = vsel %vm1678_vm15, %v1679_v42, %v1677_v53  ;;  %v2406_v42 = vld [vmem:[%s3381_s7] sm:$0xff]  ;;  %vm495_vm4 = vcmp.lt.s32.totalorder %v3364_v47, 4  ;;  %vm1108_vm5 = vcmp.eq.f32.partialorder %v3338_v52, inf  ;;  %v3429_v49 = vsub.f32 %v287_v58, %v295_v21 }
 0x106   : > { %v1681_v36 = vclz %v1680_v13  ;;  %v1106_v13 = vmul.f32 %v2675_v48, %v1105_v59  ;;  %2412 = vperm.xlu2 %2657, %v2406_v42   ;;  %v3410_v48 = vsel %vm3402_vm3, 0, %v1700_v17  ;;  %vm1110_vm6 = vcmp.eq.f32.partialorder %v3338_v52, 0.0 }
 0x107   : > { %v4059_v59 = vand.u32 2147483647, %v3221_v61  ;;  %v1111_v9 = vand.u32 2147483648, %v3338_v52  ;;  %v322_v58 = vshll.u32 %v4061_v12, %v3355_v24  ;;  %v323_v6 = vshrl.u32 %v2742_v14, %v3360_v45 }
 0x108   : > { %v2582_v35 = vadd.s32 4294967294, %v1681_v36  ;;  %2427 = vperm.xlu0 %2658, %v2409_v63   ;;  %v1107_v60 = vmul.f32 %v1106_v13, %v3338_v52  ;;  %v329_v17 = vshrl.u32 %v4060_v19, %v3360_v45  ;;  %vm337_vm7 = vcmp.lt.s32.totalorder %v3362_v0, 1 }
 0x109   : > { %v312_v15 = vand.u32 8388607, %v4059_v59  ;;  %v324_v63 = vor.u32 %v323_v6, %v322_v58  ;;  %vm338_vm8 = vcmp.lt.s32.totalorder %v3362_v0, 2  ;;  %vm339_vm9 = vcmp.lt.s32.totalorder %v3362_v0, 3 }
 0x10a   : > { %vm2583_vm0 = vcmp.lt.s32.totalorder %v2582_v35, 0  ;;  %v1109_v31 = vsel %vm1108_vm5, %v3338_v52, %v1107_v60  ;;  %vm1718_vm13 = vweird.f32 %v3213_v34  ;;  %v478_v0 = vshrl.u32 %v2742_v14, %v3367_v46 }
 0x10b   : > { %v1684_v27 = vsel %vm2583_vm0, 0, %v2582_v35  ;;  %v336_v35 = vor.u32 %v335_v2, %v334_v44  ;;  %v313_v13 = vor.u32 8388608, %v312_v15 }
 0x10c   : > { %v1685_v28 = vsub.s32 32, %v1684_v27  ;;  %v1686_v37 = vshll.u32 %v1677_v53, %v1684_v27  ;;  %v1689_v10 = vsub.s32 4294967266, %v1684_v27  ;;  %v346_v27 = vsel %vm340_vm2, %v333_v18, 920167782 }
 0x10e   : > { %v1687_v20 = vshrl.u32 %v1669_v38, %v1685_v28  ;;  %v1690_v50 = vadd.s32 127, %v1689_v10  ;;  %v774_v38 = vshrl.u32 %v773_v5, 23  ;;  %v350_v10 = vsel %vm340_vm2, %v336_v35, 1326507024  ;;  %2422 = vperm.xlu2 %2657, %v2408_v33  }
 0x10f   : > { %v325_v5 = vshll.u32 %v2742_v14, %v3355_v24 }
 0x110   : > { %v1688_v4 = vor.u32 %v1687_v20, %v1686_v37  ;;  %v1691_v23 = vshll.u32 %v1690_v50, 23  ;;  %v2342_v37 = vadd.s32 3, %v3410_v48  ;;  %v3423_v20 = vsel %vm495_vm4, %v3406_v41, 920167782 }
 0x111   : > { %v3427_v50 = vsel %vm495_vm4, %v491_v57, 1326507024  ;;  %v2568_v11 = vadd.s32 4294967169, %v774_v38 }
 0x112   : > { %v1692_v53 = vor.u32 4788187, %v1691_v23  ;;  %v1695_v1 = vcvt.s32.f32 %v1688_v4  ;;  %v3443_v2 = vand.u32 3, %v2342_v37 }
 0x113   : > { %v3459_v35 = vadd.s32 1, %v2568_v11 }
 0x114   : > { %v1693_v40 = vand.u32 2147483647, %v1692_v53  ;;  %v326_v53 = vshrl.u32 %v4063_v16, %v3360_v45  ;;  %vm2345_vm10 = vcmp.eq.s32.totalorder %v3443_v2, 0  ;;  %vm2344_vm11 = vcmp.lt.s32.totalorder %v3443_v2, 2 }
 0x115   : > { %vm2348_vm14 = vcmp.eq.s32.totalorder %v3443_v2, 2  ;;  %vm781_vm5 = vcmp.gt.s32.totalorder %v3459_v35, 0 }
 0x116   : > { %v1696_v56 = vmul.f32 %v1695_v1, %v1693_v40  ;;  %v328_v1 = vshll.u32 %v4063_v16, %v3355_v24  ;;  %v327_v36 = vor.u32 %v326_v53, %v325_v5  ;;  %v3464_v24 = vsel %vm1110_vm6, %v1111_v9, %v1109_v31 }
 0x117   : > { %v351_v31 = vsel %vm339_vm9, %v333_v18, %v350_v10  ;;  %vm493_vm6 = vcmp.lt.s32.totalorder %v3364_v47, 2 }
 0x118   : > { %v1697_v28 = vxor.u32 2147483648, %v1696_v56  ;;  %v330_v40 = vor.u32 %v329_v17, %v328_v1 }
 0x11a   : > { %v1698_v44 = vsel %vm1577_vm1, %v1697_v28, %v1696_v56  ;;  %v345_v56 = vsel %vm337_vm7, %v324_v63, %v327_v36  ;;  %v347_v60 = vsel %vm339_vm9, %v330_v40, %v346_v27  ;;  %v349_v28 = vsel %vm337_vm7, %v327_v36, %v330_v40 }
 0x11b   : > { %v1701_v4 = vsel %vm3402_vm3, %v3213_v34, %v1698_v44  ;;  %v321_v44 = vshrl.u32 %v4061_v12, %v3360_v45  ;;  %v348_v33 = vsel %vm338_vm8, %v345_v56, %v347_v60  ;;  %v342_v52 = vsel %vm340_vm2, %v330_v40, 2102212464 }
 0x11c   : > { %v1703_v23 = vmul.f32 %v1701_v4, %v1701_v4  ;;  %v3481_v27 = vshll.u32 %v313_v13, 8  ;;  %v378_v9 = vand.u32 65535, %v348_v33  ;;  %v352_v45 = vsel %vm338_vm8, %v349_v28, %v351_v31 }
 0x11d   : > { %v379_v6 = vshrl.u32 %v348_v33, 16  ;;  %v356_v1 = vand.u32 65535, %v352_v45  ;;  %v357_v17 = vshrl.u32 %v352_v45, 16  ;;  %v343_v60 = vsel %vm339_vm9, %v327_v36, %v342_v52 }
 0x11e   : > { %v1704_v42 = vmul.f32 -0.001358992, %v1703_v23  ;;  %v1711_v21 = vmul.f32 -0.00019511016, %v1703_v23  ;;  %v354_v5 = vand.u32 65535, %v3481_v27  ;;  %v355_v53 = vshrl.u32 %v3481_v27, 16 }
 0x11f   : > { %vm492_vm3 = vcmp.lt.s32.totalorder %v3364_v47, 1 }
 0x120   : > { %v1705_v57 = vadd.f32 0.041655596, %v1704_v42  ;;  %v1712_v38 = vadd.f32 0.008332121, %v1711_v21  ;;  %v4058_v42 = vand.u32 2147483647, %v3229_v7  ;;  %v341_v21 = vsel %vm337_vm7, %v321_v44, %v324_v63 }
 0x121   : > { %v358_v13 = vmul.u32 %v356_v1, %v354_v5  ;;  %v359_v40 = vmul.u32 %v357_v17, %v354_v5  ;;  %v381_v28 = vmul.u32 %v379_v6, %v354_v5  ;;  %v380_v33 = vmul.u32 %v378_v9, %v354_v5 }
 0x122   : > { %v1706_v37 = vmul.f32 %v1705_v57, %v1703_v23  ;;  %v1713_v11 = vmul.f32 %v1712_v38, %v1703_v23  ;;  %v360_v57 = vmul.u32 %v356_v1, %v355_v53  ;;  %v467_v63 = vand.u32 8388607, %v4058_v42 }
 0x123   : > { %v383_v45 = vmul.u32 %v379_v6, %v355_v53  ;;  %v384_v1 = vshll.u32 %v381_v28, 16  ;;  %v363_v5 = vshrl.u32 %v359_v40, 16  ;;  %vm494_vm7 = vcmp.lt.s32.totalorder %v3364_v47, 3 }
 0x124   : > { %v1707_v58 = vadd.f32 -0.4999988, %v1706_v37  ;;  %v1714_v15 = vadd.f32 -0.16666654, %v1713_v11  ;;  %v361_v37 = vmul.u32 %v357_v17, %v355_v53  ;;  %v362_v11 = vshll.u32 %v359_v40, 16 }
 0x125   : > { %vm388_vm1 = vc.u32 %v380_v33, %v384_v1 }
 0x126   : > { %v1708_v18 = vmul.f32 %v1707_v58, %v1703_v23  ;;  %v1715_v10 = vmul.f32 %v1714_v15, %v1703_v23  ;;  %v364_v23 = vshll.u32 %v360_v57, 16  ;;  %v382_v15 = vmul.u32 %v378_v9, %v355_v53 }
 0x127   : > { %vm366_vm15 = vc.u32 %v358_v13, %v362_v11  ;;  %v368_v44 = vadd.s32 %v362_v11, %v358_v13  ;;  %v389_v17 = vsel %vm388_vm1, 1, %v2740_v8 }
 0x128   : > { %v3493_v38 = vadd.f32 1.0, %v1708_v18  ;;  %v1716_v56 = vadd.f32 1.0, %v1715_v10  ;;  %v386_v52 = vshll.u32 %v382_v15, 16  ;;  %v390_v10 = vadd.s32 %v384_v1, %v380_v33 }
 0x129   : > { %vm370_vm0 = vc.u32 %v368_v44, %v364_v23  ;;  %v391_v40 = vadd.s32 %v389_v17, %v383_v45  ;;  %v344_v23 = vsel %vm338_vm8, %v341_v21, %v343_v60  ;;  %v385_v44 = vshrl.u32 %v381_v28, 16  ;;  %v2407_v17 = vld [vmem:[%s3381_s7 + $0x8] sm:$0xff] }
 0x12a   : > { %v3497_v31 = vmul.f32 %v1716_v56, %v1701_v4  ;;  %v4055_v58 = vxor.u32 2147483648, %v3493_v38  ;;  %v367_v4 = vsel %vm366_vm15, 1, %v2740_v8  ;;  %v371_v53 = vsel %vm370_vm0, 1, %v2740_v8 }
 0x12b   : > { %v369_v9 = vadd.s32 %v367_v4, %v361_v37  ;;  %v365_v56 = vshrl.u32 %v360_v57, 16  ;;  %vm392_vm2 = vc.u32 %v390_v10, %v386_v52  ;;  %v387_v43 = vshrl.u32 %v382_v15, 16 }
 0x12c   : > { %v4056_v18 = vxor.u32 2147483648, %v3497_v31  ;;  %v2350_v36 = vsel %vm2348_vm14, %v4055_v58, %v3497_v31  ;;  %v393_v33 = vsel %vm392_vm2, 1, %v2740_v8  ;;  %v3524_v1 = vadd.s32 %v390_v10, %v386_v52 }
 0x12d   : > { %v373_v11 = vadd.s32 %v371_v53, %v369_v9  ;;  %v395_v2 = vadd.s32 %v393_v33, %v391_v40  ;;  %v468_v57 = vor.u32 8388608, %v467_v63  ;;  %v477_v45 = vshll.u32 %v4061_v12, %v3357_v29 }
 0x12e   : > { %v2347_v6 = vsel %vm2345_vm10, %v3493_v38, %v4056_v18  ;;  %v480_v21 = vshll.u32 %v2742_v14, %v3357_v29  ;;  %v481_v60 = vshrl.u32 %v4063_v16, %v3367_v46  ;;  %v483_v15 = vshll.u32 %v4063_v16, %v3357_v29 }
 0x12f   : > { %v2351_v13 = vsel %vm2344_vm11, %v2347_v6, %v2350_v36  ;;  %v374_v26 = vadd.s32 %v373_v11, %v363_v5  ;;  %v396_v28 = vadd.s32 %v395_v2, %v385_v44  ;;  %v484_v63 = vshrl.u32 %v4060_v19, %v3367_v46 }
 0x130   : > { %v2352_v37 = vsel %vm1718_vm13, nan, %v2351_v13  ;;  %v3544_v52 = vor.u32 %v478_v0, %v477_v45  ;;  %v3546_v5 = vor.u32 %v481_v60, %v480_v21  ;;  %v3560_v53 = vshll.u32 %v468_v57, 8 }
 0x131   : > { %v2356_v4 = vmul.f32 %v2352_v37, %v3464_v24  ;;  %v3529_v36 = vadd.s32 %v374_v26, %v365_v56  ;;  %v398_v26 = vmul.u32 %v3481_v27, %v344_v23  ;;  %v397_v9 = vadd.s32 %v396_v28, %v387_v43 }
 0x132   : > { %v485_v6 = vor.u32 %v484_v63, %v483_v15  ;;  %v500_v29 = vsel %vm492_vm3, %v3544_v52, %v3546_v5  ;;  %v506_v27 = vsel %vm494_vm7, %v3406_v41, %v3427_v50  ;;  %v3563_v43 = vmul.f32 6.2831855, %v3429_v49 }
 0x133   : > { %2367 = vrot.lane.b32.xlu1 %v2356_v4, %s2747_s26  ;;  %vm400_vm8 = vc.u32 %v3529_v36, %v3524_v1  ;;  %v401_v10 = vadd.s32 1, %v397_v9  ;;  %v509_v50 = vand.u32 65535, %v3560_v53  ;;  %v782_v49 = vsel %vm781_vm5, %v3459_v35, 0 }
 0x134   : > { %v502_v13 = vsel %vm494_vm7, %v485_v6, %v3423_v20  ;;  %v504_v56 = vsel %vm492_vm3, %v3546_v5, %v485_v6  ;;  %v510_v37 = vshrl.u32 %v3560_v53, 16  ;;  %v618_v2 = vand.u32 2139095040, %v3563_v43 }
 0x135   : > { %v503_v11 = vsel %vm493_vm6, %v500_v29, %v502_v13  ;;  %v507_v41 = vsel %vm493_vm6, %v504_v56, %v506_v27  ;;  %v402_v40 = vsel %vm400_vm8, %v401_v10, %v397_v9  ;;  %v3582_v45 = vand.u32 31, %v782_v49 }
 0x136   : > { %v511_v20 = vand.u32 65535, %v507_v41  ;;  %v403_v23 = vadd.s32 %v402_v40, %v398_v26  ;;  %v512_v44 = vshrl.u32 %v507_v41, 16  ;;  %v533_v4 = vand.u32 65535, %v503_v11 }
 0x137   : > { %v534_v33 = vshrl.u32 %v503_v11, 16  ;;  %v619_v26 = vshrl.u32 %v618_v2, 23  ;;  %v3587_v13 = vsub.s32 32, %v3582_v45  ;;  %v497_v2 = vsel %vm495_vm4, %v485_v6, 2102212464 }
 0x138   : > { %v515_v57 = vmul.u32 %v511_v20, %v510_v37  ;;  %v404_v0 = vadd.s32 536870912, %v403_v23  ;;  %v513_v21 = vmul.u32 %v511_v20, %v509_v50  ;;  %v514_v60 = vmul.u32 %v512_v44, %v509_v50 }
 0x139   : > { %v535_v28 = vmul.u32 %v533_v4, %v509_v50  ;;  %v536_v15 = vmul.u32 %v534_v33, %v509_v50  ;;  %v537_v35 = vmul.u32 %v533_v4, %v510_v37  ;;  %v516_v9 = vmul.u32 %v512_v44, %v510_v37 }
 0x13a   : > { %v3584_v63 = vshrl.u32 %v404_v0, 30  ;;  %v517_v29 = vshll.u32 %v514_v60, 16  ;;  %v519_v27 = vshll.u32 %v515_v57, 16  ;;  %v538_v11 = vmul.u32 %v534_v33, %v510_v37 }
 0x13b   : > { %2417 = vperm.xlu1 %2659, %v2407_v17   ;;  %v539_v17 = vshll.u32 %v536_v15, 16  ;;  %v541_v10 = vshll.u32 %v537_v35, 16  ;;  %v476_v20 = vshrl.u32 %v4061_v12, %v3367_v46  ;;  %v518_v44 = vshrl.u32 %v514_v60, 16 }
 0x13c   : > { %vm521_vm9 = vc.u32 %v513_v21, %v517_v29  ;;  %v523_v56 = vadd.s32 %v517_v29, %v513_v21  ;;  %v406_v41 = vshll.u32 %v3584_v63, 30  ;;  %v799_v37 = vshll.u32 %v2745_v22, %v3582_v45 }
 0x13d   : > { %v522_v40 = vsel %vm521_vm9, 1, %v2740_v8  ;;  %vm543_vm10 = vc.u32 %v535_v28, %v539_v17  ;;  %v545_v50 = vadd.s32 %v539_v17, %v535_v28  ;;  %v800_v33 = vshrl.u32 %v2746_v32, %v3587_v13 }
 0x13e   : > { %v524_v4 = vadd.s32 %v522_v40, %v516_v9  ;;  %vm525_vm11 = vc.u32 %v523_v56, %v519_v27  ;;  %v544_v21 = vsel %vm543_vm10, 1, %v2740_v8  ;;  %v520_v28 = vshrl.u32 %v515_v57, 16 }
 0x13f   : > { %v526_v0 = vsel %vm525_vm11, 1, %v2740_v8  ;;  %vm547_vm14 = vc.u32 %v545_v50, %v541_v10  ;;  %v3601_v46 = vsub.s32 %v403_v23, %v406_v41  ;;  %v540_v60 = vshrl.u32 %v536_v15, 16 }
 0x140   : > { %v528_v29 = vadd.s32 %v526_v0, %v524_v4  ;;  %v546_v9 = vadd.s32 %v544_v21, %v538_v11  ;;  %v548_v27 = vsel %vm547_vm14, 1, %v2740_v8  ;;  %v3604_v6 = vshrl.u32 %v782_v49, 5 }
 0x141   : > { %v496_v17 = vsel %vm492_vm3, %v476_v20, %v3544_v52  ;;  %v498_v56 = vsel %vm494_vm7, %v3546_v5, %v497_v2  ;;  %v2565_v58 = vadd.s32 4294967169, %v619_v26  ;;  %v542_v57 = vshrl.u32 %v537_v35, 16 }
 0x142   : > { %v529_v40 = vadd.s32 %v528_v29, %v518_v44  ;;  %v550_v4 = vadd.s32 %v548_v27, %v546_v9  ;;  %v4057_v23 = vand.u32 2147483647, %v3369_v51  ;;  %v796_v15 = vshll.u32 %v4060_v19, %v3582_v45 }
 0x143   : > { %v797_v49 = vshrl.u32 %v2745_v22, %v3587_v13  ;;  %v3619_v41 = vadd.s32 %v545_v50, %v541_v10  ;;  %v801_v52 = vor.u32 %v800_v33, %v799_v37  ;;  %v409_v20 = vsub.s32 0, %v3601_v46 }
 0x144   : > { %v3617_v11 = vadd.s32 %v529_v40, %v520_v28  ;;  %v499_v5 = vsel %vm493_vm6, %v496_v17, %v498_v56  ;;  %v551_v35 = vadd.s32 %v550_v4, %v540_v60  ;;  %vm805_vm4 = vcmp.lt.s32.totalorder %v3604_v6, 4 }
 0x145   : > { %vm408_vm15 = vcmp.lt.s32.totalorder %v3601_v46, 0  ;;  %v790_v26 = vshll.u32 %v2742_v14, %v3582_v45  ;;  %v777_v2 = vand.u32 8388607, %v4057_v23  ;;  %v791_v10 = vshrl.u32 %v4063_v16, %v3587_v13 }
 0x146   : > { %v552_v44 = vadd.s32 %v551_v35, %v542_v57  ;;  %v793_v50 = vshll.u32 %v4063_v16, %v3582_v45  ;;  %v625_v47 = vadd.s32 1, %v2565_v58  ;;  %v553_v0 = vmul.u32 %v3560_v53, %v499_v5 }
 0x147   : > { %vm555_vm0 = vc.u32 %v3617_v11, %v3619_v41  ;;  %v794_v21 = vshrl.u32 %v4060_v19, %v3587_v13  ;;  %v798_v37 = vor.u32 %v797_v49, %v796_v15  ;;  %v815_v33 = vsel %vm805_vm4, %v801_v52, 1326507024 }
 0x148   : > { %v410_v28 = vsel %vm408_vm15, %v409_v20, %v3601_v46  ;;  %v556_v29 = vadd.s32 1, %v552_v44  ;;  %v787_v60 = vshll.u32 %v4061_v12, %v3582_v45  ;;  %v788_v58 = vshrl.u32 %v2742_v14, %v3587_v13 }
 0x149   : > { %v3646_v53 = vor.u32 %v791_v10, %v790_v26  ;;  %v3648_v9 = vor.u32 %v794_v21, %v793_v50  ;;  %v778_v17 = vor.u32 8388608, %v777_v2  ;;  %vm802_vm1 = vcmp.lt.s32.totalorder %v3604_v6, 1 }
 0x14a   : > { %v557_v27 = vsel %vm555_vm0, %v556_v29, %v552_v44  ;;  %vm804_vm2 = vcmp.lt.s32.totalorder %v3604_v6, 3  ;;  %v411_v56 = vclz %v410_v28  ;;  %vm803_vm3 = vcmp.lt.s32.totalorder %v3604_v6, 2 }
 0x14b   : > { %v558_v40 = vadd.s32 %v557_v27, %v553_v0  ;;  %v3653_v4 = vor.u32 %v788_v58, %v787_v60  ;;  %v814_v45 = vsel %vm802_vm1, %v3646_v53, %v3648_v9  ;;  %v816_v15 = vsel %vm804_vm2, %v798_v37, %v815_v33 }
 0x14c   : > { %vm626_vm5 = vcmp.gt.s32.totalorder %v625_v47, 0  ;;  %v811_v49 = vsel %vm805_vm4, %v798_v37, 920167782  ;;  %v817_v52 = vsel %vm803_vm3, %v814_v45, %v816_v15  ;;  %v3665_v20 = vshll.u32 %v778_v17, 8 }
 0x14d   : > { %v559_v57 = vadd.s32 536870912, %v558_v40  ;;  %v2560_v5 = vadd.s32 4294967294, %v411_v56  ;;  %v821_v26 = vand.u32 65535, %v817_v52  ;;  %v822_v44 = vshrl.u32 %v817_v52, 16 }
 0x14e   : > { %v819_v2 = vand.u32 65535, %v3665_v20  ;;  %v820_v10 = vshrl.u32 %v3665_v20, 16  ;;  %v810_v0 = vsel %vm802_vm1, %v3653_v4, %v3646_v53  ;;  %v812_v21 = vsel %vm804_vm2, %v3648_v9, %v811_v49 }
 0x14f   : > { %v3667_v35 = vshrl.u32 %v559_v57, 30  ;;  %v627_v37 = vsel %vm626_vm5, %v625_v47, 0  ;;  %vm2561_vm6 = vcmp.lt.s32.totalorder %v2560_v5, 0  ;;  %v813_v58 = vsel %vm803_vm3, %v810_v0, %v812_v21 }
 0x150   : > { %v823_v33 = vmul.u32 %v821_v26, %v819_v2  ;;  %v824_v28 = vmul.u32 %v822_v44, %v819_v2  ;;  %v3679_v29 = vmul.u32 %v821_v26, %v820_v10  ;;  %v3685_v17 = vand.u32 31, %v627_v37 }
 0x151   : > { %v561_v50 = vshll.u32 %v3667_v35, 30  ;;  %v3690_v47 = vsel %vm2561_vm6, 0, %v2560_v5  ;;  %v826_v45 = vmul.u32 %v822_v44, %v820_v10  ;;  %v843_v52 = vand.u32 65535, %v813_v58 }
 0x152   : > { %v827_v27 = vshll.u32 %v824_v28, 16  ;;  %v829_v57 = vshll.u32 %v3679_v29, 16  ;;  %v844_v26 = vshrl.u32 %v813_v58, 16  ;;  %v3694_v0 = vshrl.u32 %v627_v37, 5 }
 0x153   : > { %v3681_v60 = vsub.s32 %v558_v40, %v561_v50  ;;  %v3697_v21 = vsub.s32 32, %v3685_v17  ;;  %v419_v18 = vsub.s32 4294967266, %v3690_v47  ;;  %v641_v42 = vshll.u32 %v4060_v19, %v3685_v17 }
 0x154   : > { %vm831_vm8 = vc.u32 %v823_v33, %v827_v27  ;;  %v833_v15 = vadd.s32 %v827_v27, %v823_v33  ;;  %v845_v33 = vmul.u32 %v843_v52, %v819_v2  ;;  %v846_v27 = vmul.u32 %v844_v26, %v819_v2 }
 0x155   : > { %vm563_vm7 = vcmp.lt.s32.totalorder %v3681_v60, 0  ;;  %v564_v56 = vsub.s32 0, %v3681_v60  ;;  %v832_v49 = vsel %vm831_vm8, 1, %v2740_v8  ;;  %v848_v58 = vmul.u32 %v844_v26, %v820_v10 }
 0x156   : > { %vm835_vm9 = vc.u32 %v833_v15, %v829_v57  ;;  %v834_v23 = vadd.s32 %v832_v49, %v826_v45  ;;  %v849_v57 = vshll.u32 %v846_v27, 16  ;;  %v644_v37 = vshll.u32 %v2745_v22, %v3685_v17 }
 0x157   : > { %v565_v40 = vsel %vm563_vm7, %v564_v56, %v3681_v60  ;;  %v836_v44 = vsel %vm835_vm9, 1, %v2740_v8  ;;  %v847_v56 = vmul.u32 %v843_v52, %v820_v10  ;;  %v420_v15 = vadd.s32 127, %v419_v18 }
 0x158   : > { %v566_v50 = vclz %v565_v40  ;;  %v828_v40 = vshrl.u32 %v824_v28, 16  ;;  %v838_v59 = vadd.s32 %v836_v44, %v834_v23  ;;  %v642_v45 = vshrl.u32 %v2745_v22, %v3697_v21 }
 0x159   : > { %vm650_vm11 = vcmp.lt.s32.totalorder %v3694_v0, 4  ;;  %v851_v49 = vshll.u32 %v847_v56, 16  ;;  %vm853_vm14 = vc.u32 %v845_v33, %v849_v57  ;;  %v645_v2 = vshrl.u32 %v2746_v32, %v3697_v21 }
 0x15a   : > { %v2563_v5 = vadd.s32 4294967294, %v566_v50  ;;  %v786_v10 = vshrl.u32 %v4061_v12, %v3587_v13  ;;  %v854_v26 = vsel %vm853_vm14, 1, %v2740_v8  ;;  %v415_v18 = vsub.s32 32, %v3690_v47 }
 0x15b   : > { %v807_v22 = vsel %vm805_vm4, %v3648_v9, 2102212464  ;;  %v855_v23 = vadd.s32 %v849_v57, %v845_v33  ;;  %v856_v28 = vadd.s32 %v854_v26, %v848_v58  ;;  %v399_v50 = vadd.s32 %v3524_v1, %v3529_v36 }
 0x15c   : > { %vm2564_vm10 = vcmp.lt.s32.totalorder %v2563_v5, 0  ;;  %v421_v44 = vshll.u32 %v420_v15, 23  ;;  %v830_v32 = vshrl.u32 %v3679_v29, 16  ;;  %v850_v13 = vshrl.u32 %v846_v27, 16 }
 0x15d   : > { %v3710_v52 = vsel %vm2564_vm10, 0, %v2563_v5  ;;  %v839_v5 = vadd.s32 %v838_v59, %v828_v40  ;;  %vm857_vm15 = vc.u32 %v855_v23, %v851_v49  ;;  %v615_v12 = vand.u32 2147483647, %v3563_v43 }
 0x15e   : > { %v574_v19 = vsub.s32 4294967266, %v3710_v52  ;;  %v646_v16 = vor.u32 %v645_v2, %v644_v37  ;;  %v806_v9 = vsel %vm802_vm1, %v786_v10, %v3653_v4  ;;  %v808_v33 = vsel %vm804_vm2, %v3646_v53, %v807_v22 }
 0x15f   : > { %v858_v1 = vsel %vm857_vm15, 1, %v2740_v8  ;;  %v643_v36 = vor.u32 %v642_v45, %v641_v42  ;;  %v417_v29 = vshrl.u32 %v399_v50, %v415_v18  ;;  %v852_v59 = vshrl.u32 %v847_v56, 16 }
 0x160   : > { %v860_v58 = vadd.s32 %v858_v1, %v856_v28  ;;  %v416_v27 = vshll.u32 %v3601_v46, %v3690_v47  ;;  %v422_v57 = vor.u32 4788187, %v421_v44  ;;  %v3733_v15 = vadd.s32 %v839_v5, %v830_v32 }
 0x161   : > { %v3735_v37 = vadd.s32 %v855_v23, %v851_v49  ;;  %v575_v40 = vadd.s32 127, %v574_v19  ;;  %v809_v4 = vsel %vm803_vm3, %v806_v9, %v808_v33  ;;  %v622_v53 = vand.u32 8388607, %v615_v12 }
 0x162   : > { %v861_v2 = vadd.s32 %v860_v58, %v850_v13  ;;  %v660_v42 = vsel %vm650_vm11, %v646_v16, 1326507024  ;;  %v554_v56 = vadd.s32 %v3619_v41, %v3617_v11  ;;  %v635_v46 = vshll.u32 %v2742_v14, %v3685_v17 }
 0x163   : > { %v4073_v47 = vmov 2131351028   ;;  %v418_v19 = vor.u32 %v417_v29, %v416_v27  ;;  %v570_v6 = vsub.s32 32, %v3710_v52  ;;  %v423_v26 = vand.u32 2147483647, %v422_v57 }
 0x164   : > { %v636_v45 = vshrl.u32 %v4073_v47, %v3697_v21  ;;  %v862_v49 = vadd.s32 %v861_v2, %v852_v59  ;;  %v638_v10 = vshll.u32 %v4073_v47, %v3685_v17  ;;  %v863_v18 = vmul.u32 %v3665_v20, %v809_v4 }
 0x165   : > { %vm865_vm4 = vc.u32 %v3733_v15, %v3735_v37  ;;  %v4074_v16 = vmov 2102212464   ;;  %v576_v41 = vshll.u32 %v575_v40, 23  ;;  %v623_v23 = vor.u32 8388608, %v622_v53 }
 0x166   : > { %v639_v11 = vshrl.u32 %v4074_v16, %v3697_v21  ;;  %v866_v22 = vadd.s32 1, %v862_v49  ;;  %v3757_v28 = vor.u32 %v636_v45, %v635_v46  ;;  %v4075_v50 = vmov 683565275  }
 0x167   : > { %v632_v44 = vshll.u32 %v4075_v50, %v3685_v17  ;;  %v633_v32 = vshrl.u32 %v2742_v14, %v3697_v21  ;;  %vm647_vm0 = vcmp.lt.s32.totalorder %v3694_v0, 1  ;;  %v425_v20 = vcvt.s32.f32 %v418_v19 }
 0x168   : > { %v3763_v5 = vor.u32 %v639_v11, %v638_v10  ;;  %v572_v13 = vshrl.u32 %v554_v56, %v570_v6  ;;  %v867_v9 = vsel %vm865_vm4, %v866_v22, %v862_v49  ;;  %vm649_vm1 = vcmp.lt.s32.totalorder %v3694_v0, 3 }
 0x169   : > { %v868_v33 = vadd.s32 %v867_v9, %v863_v18  ;;  %vm648_vm2 = vcmp.lt.s32.totalorder %v3694_v0, 2  ;;  %v426_v1 = vmul.f32 %v425_v20, %v423_v26  ;;  %v571_v29 = vshll.u32 %v3681_v60, %v3710_v52 }
 0x16a   : > { %v577_v17 = vor.u32 4788187, %v576_v41  ;;  %v659_v14 = vsel %vm647_vm0, %v3757_v28, %v3763_v5  ;;  %v3774_v58 = vor.u32 %v633_v32, %v632_v44  ;;  %v661_v27 = vsel %vm649_vm1, %v643_v36, %v660_v42 }
 0x16b   : > { %v869_v59 = vadd.s32 536870912, %v868_v33  ;;  %v3778_v57 = vshll.u32 %v623_v23, 8  ;;  %v656_v40 = vsel %vm650_vm11, %v643_v36, 920167782  ;;  %v573_v4 = vor.u32 %v572_v13, %v571_v29 }
 0x16c   : > { %v662_v60 = vsel %vm648_vm2, %v659_v14, %v661_v27  ;;  %v427_v46 = vxor.u32 2147483648, %v426_v1  ;;  %v578_v47 = vand.u32 2147483647, %v577_v17  ;;  %v655_v36 = vsel %vm647_vm0, %v3774_v58, %v3757_v28 }
 0x16d   : > { %v3784_v52 = vshrl.u32 %v869_v59, 30  ;;  %v664_v2 = vand.u32 65535, %v3778_v57  ;;  %v665_v53 = vshrl.u32 %v3778_v57, 16  ;;  %v666_v56 = vand.u32 65535, %v662_v60 }
 0x16e   : > { %v667_v45 = vshrl.u32 %v662_v60, 16  ;;  %v657_v19 = vsel %vm649_vm1, %v3763_v5, %v656_v40  ;;  %v580_v49 = vcvt.s32.f32 %v573_v4  ;;  %vm307_vm3 = vcmp.lt.s32.totalorder %v3221_v61, 0 }
 0x16f   : > { %v871_v42 = vshll.u32 %v3784_v52, 30  ;;  %v3796_v6 = vmul.u32 %v666_v56, %v665_v53  ;;  %v668_v10 = vmul.u32 %v666_v56, %v664_v2  ;;  %v658_v11 = vsel %vm648_vm2, %v655_v36, %v657_v19 }
 0x170   : > { %v669_v26 = vmul.u32 %v667_v45, %v664_v2  ;;  %v581_v16 = vmul.f32 %v580_v49, %v578_v47  ;;  %v428_v22 = vsel %vm307_vm3, %v427_v46, %v426_v1  ;;  %v4076_v32 = vand.u32 2147483647, %v3221_v61 }
 0x171   : > { %v872_v18 = vsub.s32 %v868_v33, %v871_v42  ;;  %v674_v44 = vshll.u32 %v3796_v6, 16  ;;  %v671_v13 = vmul.u32 %v667_v45, %v665_v53  ;;  %v688_v17 = vand.u32 65535, %v658_v11 }
 0x172   : > { %v672_v41 = vshll.u32 %v669_v26, 16  ;;  %vm3806_vm6 = vcmp.le.f32.partialorder %v4076_v32, 0.7853982  ;;  %v689_v14 = vshrl.u32 %v658_v11, 16  ;;  %v582_v59 = vxor.u32 2147483648, %v581_v16 }
 0x173   : > { %vm873_vm5 = vcmp.lt.s32.totalorder %v872_v18, 0  ;;  %v874_v23 = vsub.s32 0, %v872_v18  ;;  %v3814_v1 = vsel %vm3806_vm6, %v3221_v61, %v428_v22  ;;  %vm462_vm9 = vcmp.lt.s32.totalorder %v3229_v7, 0 }
 0x174   : > { %vm676_vm7 = vc.u32 %v668_v10, %v672_v41  ;;  %v678_v9 = vadd.s32 %v672_v41, %v668_v10  ;;  %v3819_v60 = vmul.f32 %v3814_v1, %v3814_v1  ;;  %v691_v46 = vmul.u32 %v689_v14, %v664_v2 }
 0x175   : > { %v875_v33 = vsel %vm873_vm5, %v874_v23, %v872_v18  ;;  %v677_v29 = vsel %vm676_vm7, 1, %v2740_v8  ;;  %v692_v47 = vmul.u32 %v688_v17, %v665_v53  ;;  %v4079_v45 = vand.u32 2147483647, %v3229_v7 }
 0x176   : > { %v876_v27 = vclz %v875_v33  ;;  %vm680_vm8 = vc.u32 %v678_v9, %v674_v44  ;;  %v679_v4 = vadd.s32 %v677_v29, %v671_v13  ;;  %v583_v36 = vsel %vm462_vm9, %v582_v59, %v581_v16 }
 0x177   : > { %v681_v56 = vsel %vm680_vm8, 1, %v2740_v8  ;;  %vm3824_vm10 = vcmp.le.f32.partialorder %v4079_v45, 0.7853982  ;;  %v690_v19 = vmul.u32 %v688_v17, %v664_v2  ;;  %v864_v49 = vadd.s32 %v3735_v37, %v3733_v15 }
 0x178   : > { %v2569_v40 = vadd.s32 4294967294, %v876_v27  ;;  %v673_v11 = vshrl.u32 %v669_v26, 16  ;;  %v694_v41 = vshll.u32 %v691_v46, 16  ;;  %v683_v44 = vadd.s32 %v681_v56, %v679_v4 }
 0x179   : > { %v693_v32 = vmul.u32 %v689_v14, %v665_v53  ;;  %v441_v13 = vmul.f32 -0.00019511016, %v3819_v60  ;;  %v3836_v9 = vsel %vm3824_vm10, %v3229_v7, %v583_v36  ;;  %v631_v2 = vshrl.u32 %v4075_v50, %v3697_v21 }
 0x17a   : > { %vm2570_vm14 = vcmp.lt.s32.totalorder %v2569_v40, 0  ;;  %v696_v16 = vshll.u32 %v692_v47, 16  ;;  %vm698_vm15 = vc.u32 %v690_v19, %v694_v41  ;;  %v652_v26 = vsel %vm650_vm11, %v3763_v5, 2102212464 }
 0x17b   : > { %v879_v10 = vsel %vm2570_vm14, 0, %v2569_v40  ;;  %v675_v53 = vshrl.u32 %v3796_v6, 16  ;;  %v699_v29 = vsel %vm698_vm15, 1, %v2740_v8  ;;  %v700_v17 = vadd.s32 %v694_v41, %v690_v19 }
 0x17c   : > { %v880_v22 = vsub.s32 32, %v879_v10  ;;  %v884_v23 = vsub.s32 4294967266, %v879_v10  ;;  %v881_v33 = vshll.u32 %v872_v18, %v879_v10  ;;  %v684_v27 = vadd.s32 %v683_v44, %v673_v11 }
 0x17d   : > { %v701_v40 = vadd.s32 %v699_v29, %v693_v32  ;;  %v442_v4 = vadd.f32 0.008332121, %v441_v13  ;;  %v695_v21 = vshrl.u32 %v691_v46, 16  ;;  %vm702_vm4 = vc.u32 %v700_v17, %v696_v16 }
 0x17e   : > { %v882_v15 = vshrl.u32 %v864_v49, %v880_v22  ;;  %v885_v37 = vadd.s32 127, %v884_v23  ;;  %v434_v50 = vmul.f32 -0.001358992, %v3819_v60  ;;  %v651_v56 = vsel %vm647_vm0, %v631_v2, %v3774_v58 }
 0x17f   : > { %v703_v5 = vsel %vm702_vm4, 1, %v2740_v8  ;;  %v3852_v6 = vmul.f32 %v3836_v9, %v3836_v9  ;;  %v653_v45 = vsel %vm649_vm1, %v3757_v28, %v652_v26  ;;  %v697_v36 = vshrl.u32 %v692_v47, 16 }
 0x180   : > { %v883_v14 = vor.u32 %v882_v15, %v881_v33  ;;  %v886_v59 = vshll.u32 %v885_v37, 23  ;;  %v705_v46 = vadd.s32 %v703_v5, %v701_v40  ;;  %v3857_v10 = vadd.s32 %v684_v27, %v675_v53 }
 0x181   : > { %v3859_v11 = vadd.s32 %v700_v17, %v696_v16  ;;  %v443_v58 = vmul.f32 %v442_v4, %v3819_v60  ;;  %v435_v22 = vadd.f32 0.041655596, %v434_v50  ;;  %v654_v23 = vsel %vm648_vm2, %v651_v56, %v653_v45 }
 0x182   : > { %v887_v18 = vor.u32 4788187, %v886_v59  ;;  %v890_v49 = vcvt.s32.f32 %v883_v14  ;;  %v706_v41 = vadd.s32 %v705_v46, %v695_v21  ;;  %v429_v32 = vsub.s32 4, %v3584_v63 }
 0x183   : > { %v596_v28 = vmul.f32 -0.00019511016, %v3852_v6  ;;  %vm710_vm11 = vc.u32 %v3857_v10, %v3859_v11  ;;  %v444_v13 = vadd.f32 -0.16666654, %v443_v58  ;;  %vm772_vm0 = vcmp.lt.s32.totalorder %v3369_v51, 0 }
 0x184   : > { %v888_v19 = vand.u32 2147483647, %v887_v18  ;;  %v707_v44 = vadd.s32 %v706_v41, %v697_v36  ;;  %v4082_v16 = vand.u32 2147483647, %v3369_v51  ;;  %v708_v15 = vmul.u32 %v3778_v57, %v654_v23  ;;  %v3901_v36 = vpop.permute.xlu2 %2384 }
 0x185   : > { %v436_v37 = vmul.f32 %v435_v22, %v3819_v60  ;;  %v430_v29 = vsel %vm307_vm3, %v429_v32, %v3584_v63  ;;  %v597_v17 = vadd.f32 0.008332121, %v596_v28  ;;  %v445_v57 = vmul.f32 %v444_v13, %v3819_v60 }
 0x186   : > { %v891_v8 = vmul.f32 %v890_v49, %v888_v19  ;;  %v711_v2 = vadd.s32 1, %v707_v44  ;;  %vm3871_vm1 = vcmp.le.f32.partialorder %v4082_v16, 0.7853982  ;;  %v432_v4 = vsel %vm3806_vm6, 0, %v430_v29 }
 0x187   : > { %v437_v21 = vadd.f32 -0.4999988, %v436_v37  ;;  %v584_v50 = vsub.s32 4, %v3667_v35  ;;  %v589_v18 = vmul.f32 -0.001358992, %v3852_v6  ;;  %v598_v63 = vmul.f32 %v597_v17, %v3852_v6 }
 0x188   : > { %v892_v47 = vxor.u32 2147483648, %v891_v8  ;;  %v712_v53 = vsel %vm710_vm11, %v711_v2, %v707_v44  ;;  %v446_v46 = vadd.f32 1.0, %v445_v57  ;;  %v449_v58 = vadd.s32 3, %v432_v4  ;;  %v3920_v57 = vpop.permute.xlu0 %2394 }
 0x189   : > { %v713_v59 = vadd.s32 %v712_v53, %v708_v15  ;;  %v438_v49 = vmul.f32 %v437_v21, %v3819_v60  ;;  %v585_v41 = vsel %vm462_vm9, %v584_v50, %v3667_v35  ;;  %v599_v22 = vadd.f32 -0.16666654, %v598_v63  ;;  %v3926_v63 = vpop.permute.xlu1 %2399 }
 0x18a   : > { %v893_v0 = vsel %vm772_vm0, %v892_v47, %v891_v8  ;;  %v590_v8 = vadd.f32 0.041655596, %v589_v18  ;;  %v894_v23 = vsub.s32 4, %v3784_v52  ;;  %v447_v28 = vmul.f32 %v446_v46, %v3814_v1 }
 0x18b   : > { %v3882_v26 = vsel %vm3871_vm1, %v3369_v51, %v893_v0  ;;  %v714_v40 = vadd.s32 536870912, %v713_v59  ;;  %v439_v2 = vadd.f32 1.0, %v438_v49  ;;  %v450_v16 = vand.u32 3, %v449_v58 }
 0x18c   : > { %v3889_v14 = vmul.f32 %v3882_v26, %v3882_v26  ;;  %v587_v60 = vsel %vm3824_vm10, 0, %v585_v41  ;;  %v591_v0 = vmul.f32 %v590_v8, %v3852_v6  ;;  %v600_v35 = vmul.f32 %v599_v22, %v3852_v6 }
 0x18d   : > { %v3899_v45 = vshrl.u32 %v714_v40, 30  ;;  %v895_v15 = vsel %vm772_vm0, %v894_v23, %v3784_v52  ;;  %v453_v1 = vxor.u32 2147483648, %v447_v28  ;;  %v456_v42 = vxor.u32 2147483648, %v439_v2 }
 0x18e   : > { %v906_v27 = vmul.f32 -0.00019511016, %v3889_v14  ;;  %v899_v56 = vmul.f32 -0.001358992, %v3889_v14  ;;  %v897_v40 = vsel %vm3871_vm1, 0, %v895_v15  ;;  %vm452_vm3 = vcmp.eq.s32.totalorder %v450_v16, 0 }
 0x18f   : > { %v716_v20 = vshll.u32 %v3899_v45, 30  ;;  %v592_v21 = vadd.f32 -0.4999988, %v591_v0  ;;  %v601_v52 = vadd.f32 1.0, %v600_v35  ;;  %vm451_vm5 = vcmp.lt.s32.totalorder %v450_v16, 2 }
 0x190   : > { %v907_v5 = vadd.f32 0.008332121, %v906_v27  ;;  %v900_v44 = vadd.f32 0.041655596, %v899_v56  ;;  %v3922_v27 = vpop.permute.xlu2 %2389  ;;  %v454_v18 = vsel %vm452_vm3, %v439_v2, %v453_v1  ;;  %vm455_vm7 = vcmp.eq.s32.totalorder %v450_v16, 2 }
 0x191   : > { %v717_v32 = vsub.s32 %v713_v59, %v716_v20  ;;  %v604_v59 = vadd.s32 3, %v587_v60  ;;  %v914_v46 = vadd.s32 3, %v897_v40  ;;  %v457_v20 = vsel %vm455_vm7, %v456_v42, %v447_v28  ;;  %v3952_v15 = vpop.permute.xlu1 %2365 }
 0x192   : > { %v908_v19 = vmul.f32 %v907_v5, %v3889_v14  ;;  %v901_v37 = vmul.f32 %v900_v44, %v3889_v14  ;;  %v709_v33 = vadd.s32 %v3859_v11, %v3857_v10  ;;  %v458_v41 = vsel %vm451_vm5, %v454_v18, %v457_v20 }
 0x193   : > { %vm718_vm2 = vcmp.lt.s32.totalorder %v717_v32, 0  ;;  %v719_v13 = vsub.s32 0, %v717_v32  ;;  %v3928_v5 = vand.u32 3, %v604_v59  ;;  %v593_v8 = vmul.f32 %v592_v21, %v3852_v6  ;;  %v2362_v6 = vpop.permute.xlu0 %2361 }
 0x194   : > { %v909_v47 = vadd.f32 -0.16666654, %v908_v19  ;;  %v902_v50 = vadd.f32 -0.4999988, %v901_v37  ;;  %v3934_v22 = vmul.f32 %v601_v52, %v3836_v9  ;;  %vm448_vm8 = vweird.f32 %v3221_v61 }
 0x195   : > { %v720_v53 = vsel %vm718_vm2, %v719_v13, %v717_v32  ;;  %v915_v10 = vand.u32 3, %v914_v46  ;;  %v459_v11 = vsel %vm448_vm8, nan, %v458_v41  ;;  %v594_v60 = vadd.f32 1.0, %v593_v8 }
 0x196   : > { %v910_v29 = vmul.f32 %v909_v47, %v3889_v14  ;;  %v721_v17 = vclz %v720_v53  ;;  %v903_v23 = vmul.f32 %v902_v50, %v3889_v14  ;;  %vm607_vm9 = vcmp.eq.s32.totalorder %v3928_v5, 0 }
 0x197   : > { %v608_v9 = vxor.u32 2147483648, %v3934_v22  ;;  %vm2373_vm10 = vcmask 523264   ;;  %vm3946_vm14 = vcmp.le.f32.partialorder %v615_v12, 0.7853982  ;;  %v2402_v37 = vmul.f32 %v3901_v36, %v459_v11 }
 0x198   : > { %v2566_v4 = vadd.s32 4294967294, %v721_v17  ;;  %v911_v56 = vadd.f32 1.0, %v910_v29  ;;  %v904_v14 = vadd.f32 1.0, %v903_v23  ;;  %v2374_v35 = vsel %vm2373_vm10, %v3089_v54, %v2362_v6 }
 0x199   : > { %vm916_vm15 = vcmp.lt.s32.totalorder %v915_v10, 2  ;;  %vm617_vm4 = vcmp.lt.s32.totalorder %v3563_v43, 0  ;;  %vm917_vm11 = vcmp.eq.s32.totalorder %v915_v10, 0  ;;  %vm920_vm0 = vcmp.eq.s32.totalorder %v915_v10, 2 }
 0x19a   : > { %vm2567_vm6 = vcmp.lt.s32.totalorder %v2566_v4, 0  ;;  %v912_v44 = vmul.f32 %v911_v56, %v3882_v26  ;;  %v2413_v26 = vpop.permute.xlu2 %2412  ;;  %v611_v12 = vxor.u32 2147483648, %v594_v60  ;;  %v1719_v59 = vand.u32 3, %v3410_v48 }
 0x19b   : > { %v724_v19 = vsel %vm2567_vm6, 0, %v2566_v4  ;;  %v2430_v53 = vmul.f32 %v2413_v26, %v2374_v35  ;;  %v1411_v42 = vand.u32 3, %v3239_v39  ;;  %v609_v54 = vsel %vm607_vm9, %v594_v60, %v608_v9  ;;  %v2364_v56 = vpop.permute.xlu0 %2363 }
 0x19c   : > { %v725_v49 = vsub.s32 32, %v724_v19  ;;  %v729_v58 = vsub.s32 4294967266, %v724_v19  ;;  %v726_v47 = vshll.u32 %v717_v32, %v724_v19  ;;  %v918_v32 = vxor.u32 2147483648, %v912_v44 }
 0x19d   : > { %v2434_v17 = vadd.f32 %v2430_v53, %v2402_v37  ;;  %v921_v4 = vxor.u32 2147483648, %v904_v14  ;;  %vm1720_vm1 = vcmp.lt.s32.totalorder %v1719_v59, 2  ;;  %vm1721_vm2 = vcmp.eq.s32.totalorder %v1719_v59, 0 }
 0x19e   : > { %v727_v13 = vshrl.u32 %v709_v33, %v725_v49  ;;  %v730_v2 = vadd.s32 127, %v729_v58  ;;  %v919_v40 = vsel %vm917_vm11, %v904_v14, %v918_v32  ;;  %vm1724_vm3 = vcmp.eq.s32.totalorder %v1719_v59, 2 }
 0x19f   : > { %2438 = vst [vmem:[%s3960_s10] sm:$0xff] %v2434_v17  ;;  %vm1412_vm5 = vcmp.lt.s32.totalorder %v1411_v42, 2  ;;  %v4087_v52 = vxor.u32 2147483648, %v3497_v31  ;;  %v4088_v39 = vxor.u32 2147483648, %v3493_v38  ;;  %vm1413_vm6 = vcmp.eq.s32.totalorder %v1411_v42, 0 }
 0x1a0   : > { %v728_v28 = vor.u32 %v727_v13, %v726_v47  ;;  %v731_v16 = vshll.u32 %v730_v2, 23  ;;  %v739_v18 = vsub.s32 4, %v3899_v45  ;;  %v4089_v19 = vxor.u32 2147483648, %v3322_v25 }
 0x1a1   : > { %v1723_v48 = vsel %vm1721_vm2, %v3493_v38, %v4087_v52  ;;  %v1726_v50 = vsel %vm1724_vm3, %v4088_v39, %v3497_v31  ;;  %vm1416_vm7 = vcmp.eq.s32.totalorder %v1411_v42, 2  ;;  %v922_v33 = vsel %vm920_vm0, %v921_v4, %v912_v44 }
 0x1a2   : > { %v732_v0 = vor.u32 4788187, %v731_v16  ;;  %v735_v29 = vcvt.s32.f32 %v728_v28  ;;  %v1727_v46 = vsel %vm1720_vm1, %v1723_v48, %v1726_v50  ;;  %v1415_v20 = vsel %vm1413_vm6, %v3314_v3, %v4089_v19 }
 0x1a3   : > { %v1728_v38 = vsel %vm1718_vm13, nan, %v1727_v46  ;;  %v4090_v31 = vxor.u32 2147483648, %v3314_v3  ;;  %vm610_vm8 = vcmp.eq.s32.totalorder %v3928_v5, 2  ;;  %v923_v8 = vsel %vm916_vm15, %v919_v40, %v922_v33 }
 0x1a4   : > { %v733_v1 = vand.u32 2147483647, %v732_v0  ;;  %vm606_vm9 = vcmp.lt.s32.totalorder %v3928_v5, 2  ;;  %v612_v47 = vsel %vm610_vm8, %v611_v12, %v3934_v22  ;;  %vm913_vm13 = vweird.f32 %v3369_v51 }
 0x1a5   : > { %v2368_v58 = vpop.permute.xlu1 %2367  ;;  %v1418_v41 = vsel %vm1416_vm7, %v4090_v31, %v3322_v25  ;;  %v613_v3 = vsel %vm606_vm9, %v609_v54, %v612_v47  ;;  %v740_v25 = vsel %vm617_vm4, %v739_v18, %v3899_v45  ;;  %v1732_v2 = vmul.f32 %v1728_v38, %v3464_v24  ;;  %v2428_v45 = vpop.permute.xlu0 %2427 }
 0x1a6   : > { %v736_v36 = vmul.f32 %v735_v29, %v733_v1  ;;  %v1419_v44 = vsel %vm1412_vm5, %v1415_v20, %v1418_v41  ;;  %v924_v10 = vsel %vm913_vm13, nan, %v923_v8  ;;  %vm603_vm15 = vweird.f32 %v3229_v7 }
 0x1a7   : > { %v1420_v13 = vsel %vm1410_vm12, nan, %v1419_v44  ;;  %v614_v22 = vsel %vm603_vm15, nan, %v613_v3  ;;  %v2405_v60 = vmul.f32 %v3926_v63, %v924_v10  ;;  %v742_v51 = vsel %vm3946_vm14, 0, %v740_v25 }
 0x1a8   : > { %v737_v21 = vxor.u32 2147483648, %v736_v36  ;;  %v1730_v5 = vmul.f32 %v1420_v13, %v3344_v55  ;;  %v2377_v9 = vsel %vm2373_vm10, %v1732_v2, %v2368_v58  ;;  %v2403_v7 = vmul.f32 %v3922_v27, %v614_v22 }
 0x1a9   : > { %v2433_v26 = vmul.f32 %v2428_v45, %v2377_v9  ;;  %v759_v61 = vadd.s32 3, %v742_v51  ;;  %v2376_v27 = vsel %vm2373_vm10, %v3188_v62, %v3952_v15  ;;  %vm758_vm11 = vweird.f32 %v3563_v43 }
 0x1aa   : > { %v738_v49 = vsel %vm617_vm4, %v737_v21, %v736_v36  ;;  %v2375_v55 = vsel %vm2373_vm10, %v1730_v5, %v2364_v56  ;;  %v2423_v36 = vpop.permute.xlu2 %2422 }
 0x1ab   : > { %v741_v23 = vsel %vm3946_vm14, %v3563_v43, %v738_v49  ;;  %v2437_v63 = vadd.f32 %v2433_v26, %v2405_v60  ;;  %v760_v17 = vand.u32 3, %v759_v61  ;;  %v2432_v52 = vmul.f32 %v2423_v36, %v2376_v27 }
 0x1ac   : > { %v743_v34 = vmul.f32 %v741_v23, %v741_v23 }
 0x1ad   : > { %v2418_v14 = vpop.permute.xlu1 %2417  ;;  %2441 = vst [vmem:[%s3960_s10 + $0x18] sm:$0xff] %v2437_v63  ;;  %vm762_vm12 = vcmp.eq.s32.totalorder %v760_v17, 0  ;;  %vm765_vm14 = vcmp.eq.s32.totalorder %v760_v17, 2  ;;  %vm761_vm4 = vcmp.lt.s32.totalorder %v760_v17, 2 }
 0x1ae   : > { %v744_v11 = vmul.f32 -0.001358992, %v743_v34  ;;  %v751_v28 = vmul.f32 -0.00019511016, %v743_v34  ;;  %v2431_v32 = vmul.f32 %v2418_v14, %v2375_v55 }
 0x1b0   : > { %v745_v16 = vadd.f32 0.041655596, %v744_v11  ;;  %v752_v30 = vadd.f32 0.008332121, %v751_v28  ;;  %v2435_v37 = vadd.f32 %v2431_v32, %v2403_v7 }
 0x1b2   : > { %v746_v24 = vmul.f32 %v745_v16, %v743_v34  ;;  %v753_v6 = vmul.f32 %v752_v30, %v743_v34  ;;  %2439 = vst [vmem:[%s3960_s10 + $0x8] sm:$0xff] %v2435_v37 }
 0x1b4   : > { %v747_v0 = vadd.f32 -0.4999988, %v746_v24  ;;  %v754_v35 = vadd.f32 -0.16666654, %v753_v6 }
 0x1b6   : > { %v748_v53 = vmul.f32 %v747_v0, %v743_v34  ;;  %v755_v1 = vmul.f32 %v754_v35, %v743_v34 }
 0x1b8   : > { %v749_v29 = vadd.f32 1.0, %v748_v53  ;;  %v756_v12 = vadd.f32 1.0, %v755_v1 }
 0x1ba   : > { %v757_v59 = vmul.f32 %v756_v12, %v741_v23  ;;  %v766_v42 = vxor.u32 2147483648, %v749_v29 }
 0x1bc   : > { %v763_v54 = vxor.u32 2147483648, %v757_v59  ;;  %v767_v4 = vsel %vm765_vm14, %v766_v42, %v757_v59 }
 0x1be   : > { %v764_v40 = vsel %vm762_vm12, %v749_v29, %v763_v54 }
 0x1bf   : > { %v768_v21 = vsel %vm761_vm4, %v764_v40, %v767_v4 }
 0x1c0   : > { %v769_v62 = vsel %vm758_vm11, nan, %v768_v21 }
 0x1c1   : > { %v2404_v15 = vmul.f32 %v3920_v57, %v769_v62 }
 0x1c3   : > { %v2436_v48 = vadd.f32 %v2432_v52, %v2404_v15 }
 0x1c5   : > { %2440 = vst [vmem:[%s3960_s10 + $0x10] sm:$0xff] %v2436_v48 }
 0x1c6   : > { %2703 = shalt.err (!%p2700_p3)
}
 0x1c7   : > { %s2748_s6 = smov 128   ;;  %s2749_s7 = smov 8  }
 0x1c8   : > { %2608 = dma.vmem_to_hbm [thread:$0]  (%p2821_p5), %s2456_s15, 512, %s2458_s16, %s2443_s0, %s2748_s6, %s2748_s6, %s2749_s7  }
 0x1c9 PF: > { %p2614_p4 = scmp.ge.s32.totalorder %s2738_s23, 2  ;;  %s2472_s8 = sand.u32 1, %s2726_s20  }
 0x1ca   : > { %s2473_s9 = scalar_lea.sflag [#allocation5], %s2472_s8 }
 0x1cb   : > { %p2611_p7 = pnand %p2614_p4, %p2825_p6 }
 0x1cd   : > { %p2612_p8 = pneg %p2611_p7 }
 0x1cf   : > { %2721 = dma.done.wait (%p2612_p8), %s2473_s9, 512  }
 0x1d0   : > { %2723 = vsyncadd (%p2612_p8), %s2473_s9, 4294966784  ;;  %p16_p9 = scmp.ge.s32.totalorder %s2808_s25, 5   ;;  %s4091_s20 = smov %s2730_s21 }
 0x1d1   : > { %s4092_s21 = smov %s2734_s22  ;;  %s4093_s22 = smov %s2819_s28 }
 0x1d2   : > { %s4094_s23 = smov %s2808_s25  ;;  %18 = sbr.rel (!%p16_p9) target bundleno = 5 (0x5), region = 77 }
 0x1d7   :  { %2479 = vsyncpa [#allocation5], 1 }
 0x1d8   :  { %2481 = vsyncpa [#allocation5 + $0x1], 1 }

</bundles_post_ra>
